<compile_context>
chip_gen: v7x
topology: tpu7x:2x2x1
jax: 0.10.0
libtpu: 0.0.40
codegen_flags: <defaults>
</compile_context>

<pallas_src>
import functools

import numpy as np
import jax
import jax.numpy as jnp
from jax import lax
from jax.experimental import pallas as pl
from jax.experimental.pallas import tpu as pltpu


def _round_up(x, m):
    return (x + m - 1) // m * m


# ----------------------------- Pallas kernels ------------------------------ #
def _conv_gemm_kernel(p_ref, w_ref, b_ref, o_ref):
    """ReLU(patches @ w + b) with bf16 MXU operands and f32 accumulation."""
    x = p_ref[...]
    if x.dtype != jnp.bfloat16:
        # int8 zero-pointed patches: exact in f32 and bf16 (|x| <= 128).
        x = x.astype(jnp.float32).astype(jnp.bfloat16)
    y = jnp.dot(x, w_ref[...], preferred_element_type=jnp.float32) + b_ref[...]
    o_ref[...] = jnp.maximum(y, 0.0).astype(o_ref.dtype)


def conv_gemm(patches, w, b, *, out_dtype=jnp.bfloat16):
    """patches (M, K) int8/bf16, w (K, Cout) bf16, b (1, Cout) f32 -> (M, Cout) bf16."""
    M, K = patches.shape
    Cout = w.shape[1]
    tm = min(512, M)                      # M-tile; K and Cout stay whole in VMEM
    grid = (pl.cdiv(M, tm),)
    return pl.pallas_call(
        _conv_gemm_kernel,
        out_shape=jax.ShapeDtypeStruct((M, Cout), out_dtype),
        grid=grid,
        in_specs=[
            pl.BlockSpec((tm, K), lambda m: (m, 0)),
            pl.BlockSpec((K, Cout), lambda m: (0, 0)),   # weights resident across tiles
            pl.BlockSpec((1, Cout), lambda m: (0, 0)),
        ],
        out_specs=pl.BlockSpec((tm, Cout), lambda m: (m, 0)),
        compiler_params=pltpu.CompilerParams(
            dimension_semantics=("parallel",),            # shard M tiles across TCs
            vmem_limit_bytes=32 * 1024 * 1024,
        ),
    )(patches, w, b)


def _head_kernel(x_ref, w3_ref, b3_ref, w1_ref, b1_ref, w2_ref, b2_ref, o_ref):
    """Fused conv3 (as a dense folded matrix) + noisy-actor/critic dual head.

    x: (tb, 1024) bf16 NHWC-flattened conv2 output.
    conv3 -> (tb, 256), head L1 -> (tb, 512), head L2 -> (tb, 128) lane-dense
    (actor cols [0:na], critic col na; sliced in the wrapper)."""
    a = jnp.dot(x_ref[...], w3_ref[...], preferred_element_type=jnp.float32) + b3_ref[...]
    a = jnp.maximum(a, 0.0).astype(jnp.bfloat16)          # conv3 ReLU
    h = jnp.dot(a, w1_ref[...], preferred_element_type=jnp.float32) + b1_ref[...]
    h = jnp.maximum(h, 0.0).astype(jnp.bfloat16)          # head L1 ReLU
    o_ref[...] = jnp.dot(h, w2_ref[...], preferred_element_type=jnp.float32) + b2_ref[...]


def fused_head(x, KP):
    B, K = x.shape                        # K = h2*w2*64 (conv2 NHWC flatten)
    H3 = KP["w3h"].shape[1]               # conv3 output features (= head input K)
    Hcat = KP["hw1"].shape[1]             # 256 actor hidden + 256 critic hidden
    PAD = KP["hw2"].shape[1]              # lane-dense output width (>= 128)
    Bp = _round_up(B, 16)                 # bf16 sublane packing
    if Bp != B:
        x = jnp.concatenate([x, jnp.zeros((Bp - B, K), x.dtype)], axis=0)
    tb = min(256, Bp)
    grid = (pl.cdiv(Bp, tb),)

    def full(shape):
        return pl.BlockSpec(shape, lambda i, _s=shape: (0,) * len(_s))

    return pl.pallas_call(
        _head_kernel,
        out_shape=jax.ShapeDtypeStruct((Bp, PAD), jnp.float32),
        grid=grid,
        in_specs=[pl.BlockSpec((tb, K), lambda i: (i, 0)),
                  full((K, H3)), full((1, H3)),
                  full((H3, Hcat)), full((1, Hcat)),
                  full((Hcat, PAD)), full((1, PAD))],
        out_specs=pl.BlockSpec((tb, PAD), lambda i: (i, 0)),
        compiler_params=pltpu.CompilerParams(
            dimension_semantics=("parallel",),            # no scratch init -> safe on 2 TCs
            vmem_limit_bytes=32 * 1024 * 1024,
        ),
    )(x, KP["w3h"], KP["b3h"], KP["hw1"], KP["hb1"], KP["hw2"], KP["hb2"])


# ------------------------------- JAX glue ---------------------------------- #
def im2col_nhwc(x, k, stride):
    """NHWC im2col -> (N*Ho*Wo, k*k*C); K ordering is (kh, kw, C) to match HWIO weights."""
    N, H, W, C = x.shape
    Ho = (H - k) // stride + 1
    Wo = (W - k) // stride + 1
    cols = []
    for i in range(k):
        for j in range(k):
            cols.append(x[:, i:i + stride * (Ho - 1) + 1:stride,
                            j:j + stride * (Wo - 1) + 1:stride, :])
    p = jnp.stack(cols, axis=3)            # (N, Ho, Wo, k*k, C)
    return p.reshape(N * Ho * Wo, k * k * C), Ho, Wo


def forward(x, KP, *, n_actions):
    N = x.shape[0]
    # uint8 NCHW -> zero-pointed int8 NHWC; the 1/256 scale is folded into the conv1
    # weight and the +128 zero point into the conv1 bias at prep time.
    xi8 = (x.astype(jnp.int32) - 128).astype(jnp.int8).transpose(0, 2, 3, 1)

    p, Ho, Wo = im2col_nhwc(xi8, 8, 4)
    y = conv_gemm(p, KP["w1"], KP["b1"]).reshape(N, Ho, Wo, -1)      # bf16 NHWC
    p, Ho, Wo = im2col_nhwc(y, 4, 2)
    y = conv_gemm(p, KP["w2"], KP["b2"]).reshape(N, Ho, Wo, -1)      # bf16 NHWC

    conv2_flat = y.reshape(N, -1)          # NHWC flatten; conv3 + head fused in one call
    out = fused_head(conv2_flat, KP)       # (Bp, PAD) f32
    return out[:N, :n_actions], out[:N, n_actions:n_actions + 1]


# ------------------------------ parameters --------------------------------- #
def make_params(key, input_shape, n_actions):
    """PyTorch-layout parameters (OIHW convs, (out,in) linears, noisy sigma/eps)."""
    C, H, W = input_shape
    ks = iter(jax.random.split(key, 24))

    def u(shape, fan_in, bound=None):
        b = bound if bound is not None else 1.0 / np.sqrt(fan_in)
        return jax.random.uniform(next(ks), shape, jnp.float32, -b, b)

    P = {}
    P["cw1"], P["cb1"] = u((32, C, 8, 8), C * 64), u((32,), C * 64)
    P["cw2"], P["cb2"] = u((64, 32, 4, 4), 32 * 16), u((64,), 32 * 16)
    P["cw3"], P["cb3"] = u((64, 64, 3, 3), 64 * 9), u((64,), 64 * 9)

    h1, w1 = (H - 8) // 4 + 1, (W - 8) // 4 + 1
    h2, w2 = (h1 - 4) // 2 + 1, (w1 - 4) // 2 + 1
    h3, w3 = h2 - 2, w2 - 2
    K = 64 * h3 * w3
    sigma_init = 0.017

    def noisy(in_f, out_f, tag):
        bound = np.sqrt(3.0 / in_f)
        P[f"{tag}_w"] = u((out_f, in_f), in_f, bound=bound)
        P[f"{tag}_b"] = u((out_f,), in_f, bound=bound)
        P[f"{tag}_sw"] = jnp.full((out_f, in_f), sigma_init, jnp.float32)
        P[f"{tag}_sb"] = jnp.full((out_f,), sigma_init, jnp.float32)
        P[f"{tag}_ew"] = jax.random.normal(next(ks), (out_f, in_f), jnp.float32)
        P[f"{tag}_eb"] = jax.random.normal(next(ks), (out_f,), jnp.float32)

    noisy(K, 256, "n1")
    noisy(256, n_actions, "n2")
    P["cl_w1"], P["cl_b1"] = u((256, K), K), u((256,), K)
    P["cl_w2"], P["cl_b2"] = u((1, 256), 256), u((1,), 256)
    return P


def prepare_params(P, input_shape, n_actions):
    """Kernel-friendly layout: bf16 HWIO-flat conv weights (conv1 scale + zero-point
    folded), conv3 folded into a dense matrix over the conv2 NHWC flatten, and
    effective (noise-folded) NHWC-permuted / block-diagonal head weights."""
    C, H, W = input_shape
    h1, w1 = (H - 8) // 4 + 1, (W - 8) // 4 + 1
    h2, w2 = (h1 - 4) // 2 + 1, (w1 - 4) // 2 + 1
    h3, w3 = h2 - 2, w2 - 2
    K = 64 * h3 * w3

    KP = {}

    def conv_w(w):  # OIHW -> (kh*kw*Cin, Cout), matching the im2col (kh, kw, ci) ordering
        return w.transpose(2, 3, 1, 0).reshape(-1, w.shape[0])

    # conv1: fold 1/256 into the weight (exact), fold the int8 +128 zero point into the
    # bias using the bf16-rounded weight so the fold cancels exactly in-kernel.
    w1bf = (conv_w(P["cw1"]) * (1.0 / 256.0)).astype(jnp.bfloat16)
    KP["w1"] = w1bf
    KP["b1"] = (P["cb1"] + 128.0 * w1bf.astype(jnp.float32).sum(axis=0)).reshape(1, -1)
    KP["w2"] = conv_w(P["cw2"]).astype(jnp.bfloat16)
    KP["b2"] = P["cb2"].reshape(1, -1)

    # conv3 folded into a dense (h2*w2*64, h3*w3*64) matrix over the NHWC flatten:
    # row = conv2-output NHWC index, col = conv3-output NHWC index.
    w3hwio = np.asarray(P["cw3"]).transpose(2, 3, 1, 0)   # (3, 3, ci, co)
    Kin = h2 * w2 * 64
    Wbig = np.zeros((Kin, K), np.float32)
    for oh in range(h3):
        for ow in range(w3):
            for kh in range(3):
                for kw in range(3):
                    r, s = oh + kh, ow + kw
                    Wbig[(r * w2 + s) * 64:(r * w2 + s) * 64 + 64,
                         (oh * w3 + ow) * 64:(oh * w3 + ow) * 64 + 64] = w3hwio[kh, kw]
    KP["w3h"] = jnp.asarray(Wbig, jnp.bfloat16)
    KP["b3h"] = jnp.tile(P["cb3"], h3 * w3).reshape(1, -1)          # f32 (1, K)

    # Head: effective (noise-folded) weights; rows permuted from NCHW-flatten order
    # (PyTorch .view) to the NHWC-flatten order of the fused conv3 output.
    perm = np.arange(K).reshape(64, h3, w3).transpose(1, 2, 0).reshape(-1)
    n1w = P["n1_w"] + P["n1_sw"] * P["n1_ew"]
    n1b = P["n1_b"] + P["n1_sb"] * P["n1_eb"]
    KP["hw1"] = jnp.concatenate([n1w.T[perm], P["cl_w1"].T[perm]],
                                axis=1).astype(jnp.bfloat16)        # (K, 512)
    KP["hb1"] = jnp.concatenate([n1b, P["cl_b1"]]).reshape(1, -1)   # f32 (1, 512)

    n2w = P["n2_w"] + P["n2_sw"] * P["n2_ew"]
    n2b = P["n2_b"] + P["n2_sb"] * P["n2_eb"]
    PAD = max(128, _round_up(n_actions + 1, 128))                   # lane-dense width
    hw2 = jnp.zeros((512, PAD), jnp.float32)
    hw2 = hw2.at[:256, :n_actions].set(n2w.T)                       # actor block
    hw2 = hw2.at[256:, n_actions:n_actions + 1].set(P["cl_w2"].T)   # critic block
    KP["hw2"] = hw2.astype(jnp.bfloat16)
    hb2 = jnp.zeros((1, PAD), jnp.float32)
    hb2 = hb2.at[0, :n_actions].set(n2b)
    hb2 = hb2.at[0, n_actions:n_actions + 1].set(P["cl_b2"])
    KP["hb2"] = hb2
    return KP


# ------------------------------- reference --------------------------------- #
def ref_forward(x, P):
    fx = x.astype(jnp.float32) / 256.0
    dn = ("NCHW", "OIHW", "NCHW")
    y = lax.conv_general_dilated(fx, P["cw1"], (4, 4), "VALID", dimension_numbers=dn)
    y = jnp.maximum(y + P["cb1"][None, :, None, None], 0.0)
    y = lax.conv_general_dilated(y, P["cw2"], (2, 2), "VALID", dimension_numbers=dn)
    y = jnp.maximum(y + P["cb2"][None, :, None, None], 0.0)
    y = lax.conv_general_dilated(y, P["cw3"], (1, 1), "VALID", dimension_numbers=dn)
    y = jnp.maximum(y + P["cb3"][None, :, None, None], 0.0)
    co = y.reshape(y.shape[0], -1)                       # NCHW flatten (PyTorch .view)
    w1 = P["n1_w"] + P["n1_sw"] * P["n1_ew"]
    b1 = P["n1_b"] + P["n1_sb"] * P["n1_eb"]
    h = jnp.maximum(co @ w1.T + b1, 0.0)
    w2 = P["n2_w"] + P["n2_sw"] * P["n2_ew"]
    b2 = P["n2_b"] + P["n2_sb"] * P["n2_eb"]
    actor = h @ w2.T + b2
    hc = jnp.maximum(co @ P["cl_w1"].T + P["cl_b1"], 0.0)
    critic = hc @ P["cl_w2"].T + P["cl_b2"]
    return actor, critic


if __name__ == "__main__":
    key = jax.random.PRNGKey(0)
    kp, kx = jax.random.split(key)
    input_shape = (4, 44, 44)      # small Atari-like frame stack (C, H, W)
    n_actions = 6
    batch = 2

    P = make_params(kp, input_shape, n_actions)
    KP = prepare_params(P, input_shape, n_actions)
    x = jax.random.randint(kx, (batch,) + input_shape, 0, 256,
                           dtype=jnp.int32).astype(jnp.uint8)

    fwd = jax.jit(functools.partial(forward, n_actions=n_actions))
    actor, critic = fwd(x, KP)
    jax.block_until_ready((actor, critic))

    assert actor.shape == (batch, n_actions) and critic.shape == (batch, 1)
    a_ref, c_ref = ref_forward(x, P)
    # bf16 operands (f32 accumulation / f32 biases) -> looser tolerance vs f32 reference.
    np.testing.assert_allclose(np.asarray(actor), np.asarray(a_ref), rtol=2e-2, atol=1e-2)
    np.testing.assert_allclose(np.asarray(critic), np.asarray(c_ref), rtol=2e-2, atol=1e-2)
    print("KERNEL_OK")
</pallas_src>

<mosaic_0001>
module attributes {stable_mosaic.version = 11 : i64} {
  func.func @_conv_gemm_kernel(%arg0: i32, %arg1: memref<200x256xi8, #tpu.memory_space<vmem>>, %arg2: memref<256x32xbf16, #tpu.memory_space<vmem>>, %arg3: memref<1x32xf32, #tpu.memory_space<vmem>>, %arg4: memref<200x32xbf16, #tpu.memory_space<vmem>>) attributes {dimension_semantics = [#tpu.dimension_semantics<parallel>], iteration_bounds = array<i64: 1>, scalar_prefetch = 0 : i64, scratch_operands = 0 : i64, tpu.core_type = #tpu.core_type<tc>, window_params = [{transform_indices = @transform_0, window_bounds = array<i64: 200, 256>}, {pipeline_mode = #tpu.pipeline_mode<synchronous>, transform_indices = @transform_1, window_bounds = array<i64: 256, 32>}, {pipeline_mode = #tpu.pipeline_mode<synchronous>, transform_indices = @transform_2, window_bounds = array<i64: 1, 32>}, {transform_indices = @transform_3, window_bounds = array<i64: 200, 32>}]} {
    %c0 = arith.constant 0 : index
    %c0_0 = arith.constant 0 : index
    %0 = vector.load %arg1[%c0, %c0_0] : memref<200x256xi8, #tpu.memory_space<vmem>>, vector<200x256xi8>
    %1 = arith.sitofp %0 : vector<200x256xi8> to vector<200x256xf32>
    %2 = arith.truncf %1 : vector<200x256xf32> to vector<200x256xbf16>
    %c0_1 = arith.constant 0 : index
    %c0_2 = arith.constant 0 : index
    %3 = vector.load %arg2[%c0_1, %c0_2] : memref<256x32xbf16, #tpu.memory_space<vmem>>, vector<256x32xbf16>
    %cst = arith.constant dense<0.000000e+00> : vector<200x32xf32>
    %4 = tpu.matmul %2, %3, %cst {dimension_numbers = #tpu.dot_dimension_numbers<[1], [0], [0], [1], [0, 0, 1, 1], [], []>} : vector<200x256xbf16>, vector<256x32xbf16>, vector<200x32xf32> -> vector<200x32xf32>
    %c0_3 = arith.constant 0 : index
    %c0_4 = arith.constant 0 : index
    %5 = vector.load %arg3[%c0_3, %c0_4] : memref<1x32xf32, #tpu.memory_space<vmem>>, vector<1x32xf32>
    %6 = vector.broadcast %5 : vector<1x32xf32> to vector<200x32xf32>
    %7 = arith.addf %4, %6 : vector<200x32xf32>
    %cst_5 = arith.constant 0.000000e+00 : f32
    %8 = vector.broadcast %cst_5 : f32 to vector<200x32xf32>
    %9 = arith.maximumf %7, %8 : vector<200x32xf32>
    %10 = arith.truncf %9 : vector<200x32xf32> to vector<200x32xbf16>
    %c0_6 = arith.constant 0 : index
    %c0_7 = arith.constant 0 : index
    %11 = vector.load %arg4[%c0_6, %c0_7] : memref<200x32xbf16, #tpu.memory_space<vmem>>, vector<200x32xbf16>
    tpu.vector_store %arg4[%c0_6, %c0_7], %10 {strides = array<i32>} : memref<200x32xbf16, #tpu.memory_space<vmem>>, vector<200x32xbf16>,
    return
  }
  func.func @transform_0(%arg0: i32) -> (i32, i32) {
    %c0_i32 = arith.constant 0 : i32
    %c0_i32_0 = arith.constant 0 : i32
    return %arg0, %c0_i32 : i32, i32
  }
  func.func @transform_1(%arg0: i32) -> (i32, i32) {
    %c0_i32 = arith.constant 0 : i32
    %c0_i32_0 = arith.constant 0 : i32
    %c0_i32_1 = arith.constant 0 : i32
    return %c0_i32, %c0_i32_0 : i32, i32
  }
  func.func @transform_2(%arg0: i32) -> (i32, i32) {
    %c0_i32 = arith.constant 0 : i32
    %c0_i32_0 = arith.constant 0 : i32
    %c0_i32_1 = arith.constant 0 : i32
    return %c0_i32, %c0_i32_0 : i32, i32
  }
  func.func @transform_3(%arg0: i32) -> (i32, i32) {
    %c0_i32 = arith.constant 0 : i32
    %c0_i32_0 = arith.constant 0 : i32
    return %arg0, %c0_i32 : i32, i32
  }
}

module attributes {stable_mosaic.version = 11 : i64} {
  func.func @_conv_gemm_kernel(%arg0: i32, %arg1: memref<32x512xbf16, #tpu.memory_space<vmem>>, %arg2: memref<512x64xbf16, #tpu.memory_space<vmem>>, %arg3: memref<1x64xf32, #tpu.memory_space<vmem>>, %arg4: memref<32x64xbf16, #tpu.memory_space<vmem>>) attributes {dimension_semantics = [#tpu.dimension_semantics<parallel>], iteration_bounds = array<i64: 1>, scalar_prefetch = 0 : i64, scratch_operands = 0 : i64, tpu.core_type = #tpu.core_type<tc>, window_params = [{transform_indices = @transform_0, window_bounds = array<i64: 32, 512>}, {pipeline_mode = #tpu.pipeline_mode<synchronous>, transform_indices = @transform_1, window_bounds = array<i64: 512, 64>}, {pipeline_mode = #tpu.pipeline_mode<synchronous>, transform_indices = @transform_2, window_bounds = array<i64: 1, 64>}, {transform_indices = @transform_3, window_bounds = array<i64: 32, 64>}]} {
    %c0 = arith.constant 0 : index
    %c0_0 = arith.constant 0 : index
    %0 = vector.load %arg1[%c0, %c0_0] : memref<32x512xbf16, #tpu.memory_space<vmem>>, vector<32x512xbf16>
    %c0_1 = arith.constant 0 : index
    %c0_2 = arith.constant 0 : index
    %1 = vector.load %arg2[%c0_1, %c0_2] : memref<512x64xbf16, #tpu.memory_space<vmem>>, vector<512x64xbf16>
    %cst = arith.constant dense<0.000000e+00> : vector<32x64xf32>
    %2 = tpu.matmul %0, %1, %cst {dimension_numbers = #tpu.dot_dimension_numbers<[1], [0], [0], [1], [0, 0, 1, 1], [], []>} : vector<32x512xbf16>, vector<512x64xbf16>, vector<32x64xf32> -> vector<32x64xf32>
    %c0_3 = arith.constant 0 : index
    %c0_4 = arith.constant 0 : index
    %3 = vector.load %arg3[%c0_3, %c0_4] : memref<1x64xf32, #tpu.memory_space<vmem>>, vector<1x64xf32>
    %4 = vector.broadcast %3 : vector<1x64xf32> to vector<32x64xf32>
    %5 = arith.addf %2, %4 : vector<32x64xf32>
    %cst_5 = arith.constant 0.000000e+00 : f32
    %6 = vector.broadcast %cst_5 : f32 to vector<32x64xf32>
    %7 = arith.maximumf %5, %6 : vector<32x64xf32>
    %8 = arith.truncf %7 : vector<32x64xf32> to vector<32x64xbf16>
    %c0_6 = arith.constant 0 : index
    %c0_7 = arith.constant 0 : index
    %9 = vector.load %arg4[%c0_6, %c0_7] : memref<32x64xbf16, #tpu.memory_space<vmem>>, vector<32x64xbf16>
    tpu.vector_store %arg4[%c0_6, %c0_7], %8 {strides = array<i32>} : memref<32x64xbf16, #tpu.memory_space<vmem>>, vector<32x64xbf16>,
    return
  }
  func.func @transform_0(%arg0: i32) -> (i32, i32) {
    %c0_i32 = arith.constant 0 : i32
    %c0_i32_0 = arith.constant 0 : i32
    return %arg0, %c0_i32 : i32, i32
  }
  func.func @transform_1(%arg0: i32) -> (i32, i32) {
    %c0_i32 = arith.constant 0 : i32
    %c0_i32_0 = arith.constant 0 : i32
    %c0_i32_1 = arith.constant 0 : i32
    return %c0_i32, %c0_i32_0 : i32, i32
  }
  func.func @transform_2(%arg0: i32) -> (i32, i32) {
    %c0_i32 = arith.constant 0 : i32
    %c0_i32_0 = arith.constant 0 : i32
    %c0_i32_1 = arith.constant 0 : i32
    return %c0_i32, %c0_i32_0 : i32, i32
  }
  func.func @transform_3(%arg0: i32) -> (i32, i32) {
    %c0_i32 = arith.constant 0 : i32
    %c0_i32_0 = arith.constant 0 : i32
    return %arg0, %c0_i32 : i32, i32
  }
}

module attributes {stable_mosaic.version = 11 : i64} {
  func.func @_head_kernel(%arg0: i32, %arg1: memref<16x1024xbf16, #tpu.memory_space<vmem>>, %arg2: memref<1024x256xbf16, #tpu.memory_space<vmem>>, %arg3: memref<1x256xf32, #tpu.memory_space<vmem>>, %arg4: memref<256x512xbf16, #tpu.memory_space<vmem>>, %arg5: memref<1x512xf32, #tpu.memory_space<vmem>>, %arg6: memref<512x128xbf16, #tpu.memory_space<vmem>>, %arg7: memref<1x128xf32, #tpu.memory_space<vmem>>, %arg8: memref<16x128xf32, #tpu.memory_space<vmem>>) attributes {dimension_semantics = [#tpu.dimension_semantics<parallel>], iteration_bounds = array<i64: 1>, scalar_prefetch = 0 : i64, scratch_operands = 0 : i64, tpu.core_type = #tpu.core_type<tc>, window_params = [{transform_indices = @transform_0, window_bounds = array<i64: 16, 1024>}, {pipeline_mode = #tpu.pipeline_mode<synchronous>, transform_indices = @transform_1, window_bounds = array<i64: 1024, 256>}, {pipeline_mode = #tpu.pipeline_mode<synchronous>, transform_indices = @transform_2, window_bounds = array<i64: 1, 256>}, {pipeline_mode = #tpu.pipeline_mode<synchronous>, transform_indices = @transform_3, window_bounds = array<i64: 256, 512>}, {pipeline_mode = #tpu.pipeline_mode<synchronous>, transform_indices = @transform_4, window_bounds = array<i64: 1, 512>}, {pipeline_mode = #tpu.pipeline_mode<synchronous>, transform_indices = @transform_5, window_bounds = array<i64: 512, 128>}, {pipeline_mode = #tpu.pipeline_mode<synchronous>, transform_indices = @transform_6, window_bounds = array<i64: 1, 128>}, {transform_indices = @transform_7, window_bounds = array<i64: 16, 128>}]} {
    %c0 = arith.constant 0 : index
    %c0_0 = arith.constant 0 : index
    %0 = vector.load %arg1[%c0, %c0_0] : memref<16x1024xbf16, #tpu.memory_space<vmem>>, vector<16x1024xbf16>
    %c0_1 = arith.constant 0 : index
    %c0_2 = arith.constant 0 : index
    %1 = vector.load %arg2[%c0_1, %c0_2] : memref<1024x256xbf16, #tpu.memory_space<vmem>>, vector<1024x256xbf16>
    %cst = arith.constant dense<0.000000e+00> : vector<16x256xf32>
    %2 = tpu.matmul %0, %1, %cst {dimension_numbers = #tpu.dot_dimension_numbers<[1], [0], [0], [1], [0, 0, 1, 1], [], []>} : vector<16x1024xbf16>, vector<1024x256xbf16>, vector<16x256xf32> -> vector<16x256xf32>
    %c0_3 = arith.constant 0 : index
    %c0_4 = arith.constant 0 : index
    %3 = vector.load %arg3[%c0_3, %c0_4] : memref<1x256xf32, #tpu.memory_space<vmem>>, vector<1x256xf32>
    %4 = vector.broadcast %3 : vector<1x256xf32> to vector<16x256xf32>
    %5 = arith.addf %2, %4 : vector<16x256xf32>
    %cst_5 = arith.constant 0.000000e+00 : f32
    %6 = vector.broadcast %cst_5 : f32 to vector<16x256xf32>
    %7 = arith.maximumf %5, %6 : vector<16x256xf32>
    %8 = arith.truncf %7 : vector<16x256xf32> to vector<16x256xbf16>
    %c0_6 = arith.constant 0 : index
    %c0_7 = arith.constant 0 : index
    %9 = vector.load %arg4[%c0_6, %c0_7] : memref<256x512xbf16, #tpu.memory_space<vmem>>, vector<256x512xbf16>
    %cst_8 = arith.constant dense<0.000000e+00> : vector<16x512xf32>
    %10 = tpu.matmul %8, %9, %cst_8 {dimension_numbers = #tpu.dot_dimension_numbers<[1], [0], [0], [1], [0, 0, 1, 1], [], []>} : vector<16x256xbf16>, vector<256x512xbf16>, vector<16x512xf32> -> vector<16x512xf32>
    %c0_9 = arith.constant 0 : index
    %c0_10 = arith.constant 0 : index
    %11 = vector.load %arg5[%c0_9, %c0_10] : memref<1x512xf32, #tpu.memory_space<vmem>>, vector<1x512xf32>
    %12 = vector.broadcast %11 : vector<1x512xf32> to vector<16x512xf32>
    %13 = arith.addf %10, %12 : vector<16x512xf32>
    %cst_11 = arith.constant 0.000000e+00 : f32
    %14 = vector.broadcast %cst_11 : f32 to vector<16x512xf32>
    %15 = arith.maximumf %13, %14 : vector<16x512xf32>
    %16 = arith.truncf %15 : vector<16x512xf32> to vector<16x512xbf16>
    %c0_12 = arith.constant 0 : index
    %c0_13 = arith.constant 0 : index
    %17 = vector.load %arg6[%c0_12, %c0_13] : memref<512x128xbf16, #tpu.memory_space<vmem>>, vector<512x128xbf16>
    %cst_14 = arith.constant dense<0.000000e+00> : vector<16x128xf32>
    %18 = tpu.matmul %16, %17, %cst_14 {dimension_numbers = #tpu.dot_dimension_numbers<[1], [0], [0], [1], [0, 0, 1, 1], [], []>} : vector<16x512xbf16>, vector<512x128xbf16>, vector<16x128xf32> -> vector<16x128xf32>
    %c0_15 = arith.constant 0 : index
    %c0_16 = arith.constant 0 : index
    %19 = vector.load %arg7[%c0_15, %c0_16] : memref<1x128xf32, #tpu.memory_space<vmem>>, vector<1x128xf32>
    %20 = vector.broadcast %19 : vector<1x128xf32> to vector<16x128xf32>
    %21 = arith.addf %18, %20 : vector<16x128xf32>
    %c0_17 = arith.constant 0 : index
    %c0_18 = arith.constant 0 : index
    %22 = vector.load %arg8[%c0_17, %c0_18] : memref<16x128xf32, #tpu.memory_space<vmem>>, vector<16x128xf32>
    tpu.vector_store %arg8[%c0_17, %c0_18], %21 {strides = array<i32>} : memref<16x128xf32, #tpu.memory_space<vmem>>, vector<16x128xf32>,
    return
  }
  func.func @transform_0(%arg0: i32) -> (i32, i32) {
    %c0_i32 = arith.constant 0 : i32
    %c0_i32_0 = arith.constant 0 : i32
    return %arg0, %c0_i32 : i32, i32
  }
  func.func @transform_1(%arg0: i32) -> (i32, i32) {
    %c0_i32 = arith.constant 0 : i32
    %c0_i32_0 = arith.constant 0 : i32
    %c0_i32_1 = arith.constant 0 : i32
    return %c0_i32, %c0_i32_0 : i32, i32
  }
  func.func @transform_2(%arg0: i32) -> (i32, i32) {
    %c0_i32 = arith.constant 0 : i32
    %c0_i32_0 = arith.constant 0 : i32
    %c0_i32_1 = arith.constant 0 : i32
    return %c0_i32, %c0_i32_0 : i32, i32
  }
  func.func @transform_3(%arg0: i32) -> (i32, i32) {
    %c0_i32 = arith.constant 0 : i32
    %c0_i32_0 = arith.constant 0 : i32
    %c0_i32_1 = arith.constant 0 : i32
    return %c0_i32, %c0_i32_0 : i32, i32
  }
  func.func @transform_4(%arg0: i32) -> (i32, i32) {
    %c0_i32 = arith.constant 0 : i32
    %c0_i32_0 = arith.constant 0 : i32
    %c0_i32_1 = arith.constant 0 : i32
    return %c0_i32, %c0_i32_0 : i32, i32
  }
  func.func @transform_5(%arg0: i32) -> (i32, i32) {
    %c0_i32 = arith.constant 0 : i32
    %c0_i32_0 = arith.constant 0 : i32
    %c0_i32_1 = arith.constant 0 : i32
    return %c0_i32, %c0_i32_0 : i32, i32
  }
  func.func @transform_6(%arg0: i32) -> (i32, i32) {
    %c0_i32 = arith.constant 0 : i32
    %c0_i32_0 = arith.constant 0 : i32
    %c0_i32_1 = arith.constant 0 : i32
    return %c0_i32, %c0_i32_0 : i32, i32
  }
  func.func @transform_7(%arg0: i32) -> (i32, i32) {
    %c0_i32 = arith.constant 0 : i32
    %c0_i32_0 = arith.constant 0 : i32
    return %arg0, %c0_i32 : i32, i32
  }
}

</mosaic_0001>

<bundles_post_ra>
// kernel: forward.3
= control target key start
LH: loop header
LB: loop body
LE: loop exit
PB: predicated region body
PF: predicated region fallthrough
CT: control target
= control target key end

     0   :  { %vm589_vm0 = vcmask 257024   ;;  %s1075_s1 = inlined_call_operand.vmem [shape: bf16[256,32], index: 1, kind: input, shape index: {}]   ;;  %s1076_s0 = inlined_call_operand.vmem [shape: s8[200,256], index: 0, kind: input, shape index: {}]   ;;  %s1077_s2 = inlined_call_operand.vmem [shape: f32[1,32], index: 2, kind: input, shape index: {}]   ;;  %s1078_s3 = inlined_call_operand.vmem [shape: bf16[200,32], index: 3, kind: output, shape index: {}]  }
   0x1   :  { %v822_v0 = vld [vmem:[%s1075_s1 + $0x40] sm:$0xff]   ;;  %v824_v2 = vld [vmem:[%s1075_s1 + $0x48] sm:$0xff]   ;;  %v826_v4 = vld [vmem:[%s1075_s1 + $0x50] sm:$0xff]  }
   0x2   :  { %v823_v1 = vld [vmem:[%s1075_s1] sm:$0xff]   ;;  %712 = vmatprep.subr.bf16.mxu0 %v822_v0  ;;  %806 = vmatprep.subr.bf16.mxu1 %v822_v0  ;;  %v825_v3 = vld [vmem:[%s1075_s1 + $0x8] sm:$0xff]   ;;  %v827_v5 = vld [vmem:[%s1075_s1 + $0x10] sm:$0xff]  }
   0x3   :  { %713 = vmatpush3.bf16.msra.mxu0 %v823_v1  ;;  %814 = vmatpush3.bf16.msra.mxu1 %v823_v1  ;;  %v828_v6 = vld [vmem:[%s1075_s1 + $0x58] sm:$0xff]   ;;  %v830_v8 = vld [vmem:[%s1075_s1 + $0x60] sm:$0xff]   ;;  %v832_v10 = vld [vmem:[%s1075_s1 + $0x68] sm:$0xff]  }
   0x4   :  { %714 = vmatprep.subr.bf16.mxu0 %v824_v2  ;;  %807 = vmatprep.subr.bf16.mxu1 %v824_v2  ;;  %v829_v7 = vld [vmem:[%s1075_s1 + $0x18] sm:$0xff]   ;;  %v831_v9 = vld [vmem:[%s1075_s1 + $0x20] sm:$0xff]   ;;  %v833_v17 = vld [vmem:[%s1075_s1 + $0x28] sm:$0xff]  }
   0x5   :  { %v15_v11 = vld [vmem:[%s1076_s0] sm:$0xff]   ;;  %v29_v12 = vld [vmem:[%s1076_s0 + $0x38] sm:$0xff]   ;;  %v834_v20 = vld [vmem:[%s1075_s1 + $0x70] sm:$0xff]  }
   0x6   :  { %v40_v13 = vunpack.c.l.s8.bf16 %v15_v11  ;;  %v41_v14 = vunpack.c.h.s8.bf16 %v15_v11  ;;  %v54_v15 = vunpack.c.l.s8.bf16 %v29_v12  ;;  %v55_v16 = vunpack.c.h.s8.bf16 %v29_v12  ;;  %v835_v21 = vld [vmem:[%s1075_s1 + $0x30] sm:$0xff]   ;;  %v836_v22 = vld [vmem:[%s1075_s1 + $0x78] sm:$0xff]   ;;  %v17_v23 = vld [vmem:[%s1076_s0 + $0x8] sm:$0xff]  }
   0x7   :  { %715 = vmatpush3.bf16.msra.mxu0 %v825_v3  ;;  %815 = vmatpush3.bf16.msra.mxu1 %v825_v3  ;;  %v31_v24 = vld [vmem:[%s1076_s0 + $0x40] sm:$0xff]   ;;  %v837_v25 = vld [vmem:[%s1075_s1 + $0x38] sm:$0xff]   ;;  %v42_v26 = vunpack.c.l.s8.bf16 %v17_v23  ;;  %v43_v27 = vunpack.c.h.s8.bf16 %v17_v23  ;;  %v19_v34 = vld [vmem:[%s1076_s0 + $0x10] sm:$0xff]  }
   0x8   :  { %716 = vmatprep.subr.bf16.mxu0 %v826_v4  ;;  %808 = vmatprep.subr.bf16.mxu1 %v826_v4  ;;  %v621_v18 = vcombine.high %v40_v13, %v41_v14  ;;  %v635_v19 = vcombine.high %v54_v15, %v55_v16  ;;  %v56_v28 = vunpack.c.l.s8.bf16 %v31_v24  ;;  %v57_v29 = vunpack.c.h.s8.bf16 %v31_v24  ;;  %v33_v35 = vld [vmem:[%s1076_s0 + $0x48] sm:$0xff]   ;;  %v21_v44 = vld [vmem:[%s1076_s0 + $0x18] sm:$0xff]   ;;  %v35_v45 = vld [vmem:[%s1076_s0 + $0x50] sm:$0xff]  }
   0x9   :  { %v620_v30 = vcombine.low %v40_v13, %v41_v14  ;;  %v634_v31 = vcombine.low %v54_v15, %v55_v16  ;;  %v623_v32 = vcombine.high %v42_v26, %v43_v27  ;;  %v44_v36 = vunpack.c.l.s8.bf16 %v19_v34  ;;  %v23_v54 = vld [vmem:[%s1076_s0 + $0x20] sm:$0xff]   ;;  %v37_v55 = vld [vmem:[%s1076_s0 + $0x58] sm:$0xff]   ;;  %v25_v0 = vld [vmem:[%s1076_s0 + $0x28] sm:$0xff]  }
   0xa   :  { %359 = vmatprep.mubr.bf16.mxu0 %v621_v18  ;;  %415 = vmatprep.mubr.bf16.mxu1 %v635_v19  ;;  %v637_v33 = vcombine.high %v56_v28, %v57_v29  ;;  %v45_v37 = vunpack.c.h.s8.bf16 %v19_v34  ;;  %v58_v38 = vunpack.c.l.s8.bf16 %v33_v35  ;;  %v59_v39 = vunpack.c.h.s8.bf16 %v33_v35  ;;  %v39_v1 = vld [vmem:[%s1076_s0 + $0x60] sm:$0xf] }
   0xb   :  { %717 = vmatpush3.bf16.msra.mxu0 %v827_v5  ;;  %816 = vmatpush3.bf16.msra.mxu1 %v827_v5  ;;  %v622_v40 = vcombine.low %v42_v26, %v43_v27  ;;  %v636_v41 = vcombine.low %v56_v28, %v57_v29  ;;  %v46_v46 = vunpack.c.l.s8.bf16 %v21_v44  ;;  %v47_v47 = vunpack.c.h.s8.bf16 %v21_v44  ;;  %v948_v18 = vld [vmem:[%s1077_s2] ss:$0 sm:$0xff] }
   0xc   :  { %718 = vmatprep.subr.bf16.mxu0 %v828_v6  ;;  %809 = vmatprep.subr.bf16.mxu1 %v828_v6  ;;  %v625_v42 = vcombine.high %v44_v36, %v45_v37  ;;  %v639_v43 = vcombine.high %v58_v38, %v59_v39  ;;  %v60_v48 = vunpack.c.l.s8.bf16 %v35_v45  ;;  %v61_v49 = vunpack.c.h.s8.bf16 %v35_v45 }
   0xd   :  { %v624_v50 = vcombine.low %v44_v36, %v45_v37  ;;  %v638_v51 = vcombine.low %v58_v38, %v59_v39  ;;  %v627_v52 = vcombine.high %v46_v46, %v47_v47  ;;  %v48_v56 = vunpack.c.l.s8.bf16 %v23_v54 }
   0xe   :  { %v641_v53 = vcombine.high %v60_v48, %v61_v49  ;;  %v49_v57 = vunpack.c.h.s8.bf16 %v23_v54  ;;  %v62_v58 = vunpack.c.l.s8.bf16 %v37_v55  ;;  %v63_v59 = vunpack.c.h.s8.bf16 %v37_v55 }
   0xf   :  { %719 = vmatpush3.bf16.msra.mxu0 %v829_v7  ;;  %817 = vmatpush3.bf16.msra.mxu1 %v829_v7  ;;  %v626_v60 = vcombine.low %v46_v46, %v47_v47  ;;  %v640_v61 = vcombine.low %v60_v48, %v61_v49  ;;  %v50_v2 = vunpack.c.l.s8.bf16 %v25_v0  ;;  %v51_v3 = vunpack.c.h.s8.bf16 %v25_v0 }
  0x10   :  { %720 = vmatprep.subr.bf16.mxu0 %v830_v8  ;;  %810 = vmatprep.subr.bf16.mxu1 %v830_v8  ;;  %v629_v62 = vcombine.high %v48_v56, %v49_v57  ;;  %v643_v63 = vcombine.high %v62_v58, %v63_v59  ;;  %v64_v4 = vunpack.c.l.s8.bf16 %v39_v1  ;;  %v628_v5 = vcombine.low %v48_v56, %v49_v57 }
  0x11   :  { %v642_v6 = vcombine.low %v62_v58, %v63_v59  ;;  %v631_v7 = vcombine.high %v50_v2, %v51_v3  ;;  %v630_v12 = vcombine.low %v50_v2, %v51_v3 }
  0x12   :  { %v645_v8 = vcombine.high %v64_v4, %v64_v4  ;;  %v644_v13 = vcombine.low %v64_v4, %v64_v4 }
  0x13   :  { %721 = vmatpush3.bf16.msra.mxu0 %v831_v9  ;;  %818 = vmatpush3.bf16.msra.mxu1 %v831_v9  ;;  %v27_v9 = vld [vmem:[%s1076_s0 + $0x30] sm:$0xff]  }
  0x14   :  { %722 = vmatprep.subr.bf16.mxu0 %v832_v10  ;;  %811 = vmatprep.subr.bf16.mxu1 %v832_v10  ;;  %v52_v10 = vunpack.c.l.s8.bf16 %v27_v9  ;;  %v53_v11 = vunpack.c.h.s8.bf16 %v27_v9 }
  0x16   :  { %v633_v14 = vcombine.high %v52_v10, %v53_v11  ;;  %v632_v15 = vcombine.low %v52_v10, %v53_v11 }
  0x17   :  { %723 = vmatpush3.bf16.msra.mxu0 %v833_v17  ;;  %819 = vmatpush3.bf16.msra.mxu1 %v833_v17 }
  0x18   :  { %724 = vmatprep.subr.bf16.mxu0 %v834_v20  ;;  %812 = vmatprep.subr.bf16.mxu1 %v834_v20 }
  0x1b   :  { %725 = vmatpush3.bf16.msra.mxu0 %v835_v21  ;;  %820 = vmatpush3.bf16.msra.mxu1 %v835_v21 }
  0x1c   :  { %726 = vmatprep.subr.bf16.mxu0 %v836_v22  ;;  %813 = vmatprep.subr.bf16.mxu1 %v836_v22 }
  0x1f   :  { %727 = vmatpush3.bf16.msra.mxu0 %v837_v25  ;;  %821 = vmatpush3.bf16.msra.mxu1 %v837_v25 }
  0x22   :  { %360 = vmatmul.mubr.bf16.vlgmr.msra.gmra.mrb[0].mxu0 %v620_v30  ;;  %416 = vmatmul.mubr.bf16.vlgmr.msra.gmra.mrb[0].mxu1 %v634_v31 }
  0x23   :  { %367 = vmatprep.mubr.bf16.mxu0 %v623_v32  ;;  %423 = vmatprep.mubr.bf16.mxu1 %v637_v33 }
  0x2a   :  { %368 = vmatmul.mubr.bf16.gmra.mrb[4].mxu0 %v622_v40  ;;  %424 = vmatmul.mubr.bf16.gmra.mrb[4].mxu1 %v636_v41 }
  0x2b   :  { %375 = vmatprep.mubr.bf16.mxu0 %v625_v42  ;;  %431 = vmatprep.mubr.bf16.mxu1 %v639_v43 }
  0x32   :  { %376 = vmatmul.mubr.bf16.gmra.mrb[8].mxu0 %v624_v50  ;;  %432 = vmatmul.mubr.bf16.gmra.mrb[8].mxu1 %v638_v51 }
  0x33   :  { %383 = vmatprep.mubr.bf16.mxu0 %v627_v52  ;;  %439 = vmatprep.mubr.bf16.mxu1 %v641_v53 }
  0x3a   :  { %384 = vmatmul.mubr.bf16.gmra.mrb[12].mxu0 %v626_v60  ;;  %440 = vmatmul.mubr.bf16.gmra.mrb[12].mxu1 %v640_v61 }
  0x3b   :  { %391 = vmatprep.mubr.bf16.mxu0 %v629_v62  ;;  %447 = vmatprep.mubr.bf16.mxu1 %v643_v63 }
  0x42   :  { %392 = vmatmul.mubr.bf16.gmra.mrb[16].mxu0 %v628_v5  ;;  %448 = vmatmul.mubr.bf16.gmra.mrb[16].mxu1 %v642_v6 }
  0x43   :  { %399 = vmatprep.mubr.bf16.mxu0 %v631_v7  ;;  %455 = vmatprep.mubr.bf16.mxu1 %v645_v8 }
  0x4a   :  { %400 = vmatmul.mubr.bf16.gmra.mrb[20].mxu0 %v630_v12  ;;  %456 = vmatmul.mubr.bf16.gmra.mrb[20].mxu1 %v644_v13 }
  0x4b   :  { %407 = vmatprep.mubr.bf16.mxu0 %v633_v14 }
  0x52   :  { %408 = vmatmul.mubr.bf16.gmra.mrb[24].mxu0 %v632_v15 }
  0xf5   :  { %v728_v16 = vpop.f32.mrb[0].mxu0  ;;  %v770_v17 = vpop.f32.mrb[0].mxu1 }
  0xf6   :  { %v729_v19 = vpop.f32.mrb[1].mxu0  ;;  %v771_v20 = vpop.f32.mrb[1].mxu1 }
  0xf7   :  { %v730_v21 = vadd.f32 %v729_v19, %v728_v16  ;;  %v731_v22 = vpop.f32.mrb[2].mxu0  ;;  %v772_v23 = vadd.f32 %v771_v20, %v770_v17  ;;  %v773_v24 = vpop.f32.mrb[2].mxu1 }
  0xf8   :  { %v732_v25 = vpop.f32.mrb[3].mxu0  ;;  %v774_v26 = vpop.f32.mrb[3].mxu1 }
  0xf9   :  { %v362_v27 = vadd.f32 %v730_v21, %v948_v18  ;;  %v733_v28 = vadd.f32 %v732_v25, %v731_v22  ;;  %v418_v29 = vadd.f32 %v772_v23, %v948_v18  ;;  %v775_v30 = vadd.f32 %v774_v26, %v773_v24 }
  0xfb   :  { %v463_v31 = vmax.f32 %v362_v27, 0.0  ;;  %v365_v32 = vadd.f32 %v733_v28, %v948_v18  ;;  %v477_v33 = vmax.f32 %v418_v29, 0.0  ;;  %v421_v34 = vadd.f32 %v775_v30, %v948_v18 }
  0xfd   :  { %v687_v35 = vpack.c.bf16 %v463_v31, %v463_v31  ;;  %v464_v36 = vmax.f32 %v365_v32, 0.0  ;;  %v734_v37 = vpop.f32.mrb[4].mxu0  ;;  %v701_v38 = vpack.c.bf16 %v477_v33, %v477_v33  ;;  %v478_v39 = vmax.f32 %v421_v34, 0.0  ;;  %v776_v40 = vpop.f32.mrb[4].mxu1 }
  0xfe   :  { %v735_v41 = vpop.f32.mrb[5].mxu0  ;;  %v777_v42 = vpop.f32.mrb[5].mxu1 }
  0xff   :  { %590 = vst.msk [vmem:[%s1078_s3] sm:$0xf] %vm589_vm0, %v687_v35  ;;  %v688_v43 = vpack.c.bf16 %v464_v36, %v464_v36  ;;  %604 = vst.msk [vmem:[%s1078_s3 + $0x38] sm:$0xf] %vm589_vm0, %v701_v38  ;;  %v736_v44 = vadd.f32 %v735_v41, %v734_v37  ;;  %v737_v45 = vpop.f32.mrb[6].mxu0  ;;  %v702_v46 = vpack.c.bf16 %v478_v39, %v478_v39  ;;  %v779_v48 = vpop.f32.mrb[6].mxu1 }
 0x100   :  { %v778_v47 = vadd.f32 %v777_v42, %v776_v40  ;;  %v738_v49 = vpop.f32.mrb[7].mxu0  ;;  %v780_v50 = vpop.f32.mrb[7].mxu1 }
 0x101   :  { %591 = vst.msk [vmem:[%s1078_s3 + $0x4] sm:$0xf] %vm589_vm0, %v688_v43  ;;  %v370_v51 = vadd.f32 %v736_v44, %v948_v18  ;;  %605 = vst.msk [vmem:[%s1078_s3 + $0x3c] sm:$0xf] %vm589_vm0, %v702_v46  ;;  %v739_v52 = vadd.f32 %v738_v49, %v737_v45  ;;  %v781_v54 = vadd.f32 %v780_v50, %v779_v48 }
 0x102   :  { %v426_v53 = vadd.f32 %v778_v47, %v948_v18 }
 0x103   :  { %v465_v55 = vmax.f32 %v370_v51, 0.0  ;;  %v373_v56 = vadd.f32 %v739_v52, %v948_v18  ;;  %v429_v58 = vadd.f32 %v781_v54, %v948_v18 }
 0x104   :  { %v479_v57 = vmax.f32 %v426_v53, 0.0 }
 0x105   :  { %v689_v59 = vpack.c.bf16 %v465_v55, %v465_v55  ;;  %v466_v60 = vmax.f32 %v373_v56, 0.0  ;;  %v740_v61 = vpop.f32.mrb[8].mxu0  ;;  %v480_v63 = vmax.f32 %v429_v58, 0.0  ;;  %v782_v0 = vpop.f32.mrb[8].mxu1 }
 0x106   :  { %v703_v62 = vpack.c.bf16 %v479_v57, %v479_v57  ;;  %v741_v1 = vpop.f32.mrb[9].mxu0  ;;  %v783_v2 = vpop.f32.mrb[9].mxu1 }
 0x107   :  { %592 = vst.msk [vmem:[%s1078_s3 + $0x8] sm:$0xf] %vm589_vm0, %v689_v59  ;;  %v690_v3 = vpack.c.bf16 %v466_v60, %v466_v60  ;;  %v742_v4 = vadd.f32 %v741_v1, %v740_v61  ;;  %v743_v5 = vpop.f32.mrb[10].mxu0  ;;  %v704_v6 = vpack.c.bf16 %v480_v63, %v480_v63  ;;  %v784_v7 = vadd.f32 %v783_v2, %v782_v0  ;;  %v785_v8 = vpop.f32.mrb[10].mxu1 }
 0x108   :  { %606 = vst.msk [vmem:[%s1078_s3 + $0x40] sm:$0xf] %vm589_vm0, %v703_v62  ;;  %v744_v9 = vpop.f32.mrb[11].mxu0  ;;  %v786_v10 = vpop.f32.mrb[11].mxu1 }
 0x109   :  { %593 = vst.msk [vmem:[%s1078_s3 + $0xc] sm:$0xf] %vm589_vm0, %v690_v3  ;;  %v378_v11 = vadd.f32 %v742_v4, %v948_v18  ;;  %607 = vst.msk [vmem:[%s1078_s3 + $0x44] sm:$0xf] %vm589_vm0, %v704_v6  ;;  %v745_v12 = vadd.f32 %v744_v9, %v743_v5  ;;  %v434_v13 = vadd.f32 %v784_v7, %v948_v18 }
 0x10a   :  { %v787_v14 = vadd.f32 %v786_v10, %v785_v8 }
 0x10b   :  { %v467_v15 = vmax.f32 %v378_v11, 0.0  ;;  %v381_v16 = vadd.f32 %v745_v12, %v948_v18  ;;  %v481_v17 = vmax.f32 %v434_v13, 0.0 }
 0x10c   :  { %v437_v19 = vadd.f32 %v787_v14, %v948_v18 }
 0x10d   :  { %v691_v20 = vpack.c.bf16 %v467_v15, %v467_v15  ;;  %v468_v21 = vmax.f32 %v381_v16, 0.0  ;;  %v746_v22 = vpop.f32.mrb[12].mxu0  ;;  %v705_v23 = vpack.c.bf16 %v481_v17, %v481_v17  ;;  %v788_v25 = vpop.f32.mrb[12].mxu1 }
 0x10e   :  { %v482_v24 = vmax.f32 %v437_v19, 0.0  ;;  %v747_v26 = vpop.f32.mrb[13].mxu0  ;;  %v789_v27 = vpop.f32.mrb[13].mxu1 }
 0x10f   :  { %594 = vst.msk [vmem:[%s1078_s3 + $0x10] sm:$0xf] %vm589_vm0, %v691_v20  ;;  %v692_v28 = vpack.c.bf16 %v468_v21, %v468_v21  ;;  %608 = vst.msk [vmem:[%s1078_s3 + $0x48] sm:$0xf] %vm589_vm0, %v705_v23  ;;  %v748_v29 = vadd.f32 %v747_v26, %v746_v22  ;;  %v749_v30 = vpop.f32.mrb[14].mxu0  ;;  %v790_v32 = vadd.f32 %v789_v27, %v788_v25  ;;  %v791_v33 = vpop.f32.mrb[14].mxu1 }
 0x110   :  { %v706_v31 = vpack.c.bf16 %v482_v24, %v482_v24  ;;  %v750_v34 = vpop.f32.mrb[15].mxu0  ;;  %v792_v35 = vpop.f32.mrb[15].mxu1 }
 0x111   :  { %595 = vst.msk [vmem:[%s1078_s3 + $0x14] sm:$0xf] %vm589_vm0, %v692_v28  ;;  %v386_v36 = vadd.f32 %v748_v29, %v948_v18  ;;  %v751_v37 = vadd.f32 %v750_v34, %v749_v30  ;;  %v442_v38 = vadd.f32 %v790_v32, %v948_v18  ;;  %v793_v39 = vadd.f32 %v792_v35, %v791_v33 }
 0x112   :  { %609 = vst.msk [vmem:[%s1078_s3 + $0x4c] sm:$0xf] %vm589_vm0, %v706_v31 }
 0x113   :  { %v469_v40 = vmax.f32 %v386_v36, 0.0  ;;  %v389_v41 = vadd.f32 %v751_v37, %v948_v18  ;;  %v483_v42 = vmax.f32 %v442_v38, 0.0  ;;  %v445_v43 = vadd.f32 %v793_v39, %v948_v18 }
 0x115   :  { %v693_v44 = vpack.c.bf16 %v469_v40, %v469_v40  ;;  %v470_v45 = vmax.f32 %v389_v41, 0.0  ;;  %v752_v46 = vpop.f32.mrb[16].mxu0  ;;  %v707_v47 = vpack.c.bf16 %v483_v42, %v483_v42  ;;  %v484_v48 = vmax.f32 %v445_v43, 0.0  ;;  %v794_v49 = vpop.f32.mrb[16].mxu1 }
 0x116   :  { %v753_v50 = vpop.f32.mrb[17].mxu0  ;;  %v795_v51 = vpop.f32.mrb[17].mxu1 }
 0x117   :  { %596 = vst.msk [vmem:[%s1078_s3 + $0x18] sm:$0xf] %vm589_vm0, %v693_v44  ;;  %v694_v52 = vpack.c.bf16 %v470_v45, %v470_v45  ;;  %610 = vst.msk [vmem:[%s1078_s3 + $0x50] sm:$0xf] %vm589_vm0, %v707_v47  ;;  %v754_v53 = vadd.f32 %v753_v50, %v752_v46  ;;  %v755_v54 = vpop.f32.mrb[18].mxu0  ;;  %v708_v55 = vpack.c.bf16 %v484_v48, %v484_v48  ;;  %v797_v57 = vpop.f32.mrb[18].mxu1 }
 0x118   :  { %v796_v56 = vadd.f32 %v795_v51, %v794_v49  ;;  %v756_v58 = vpop.f32.mrb[19].mxu0  ;;  %v798_v59 = vpop.f32.mrb[19].mxu1 }
 0x119   :  { %597 = vst.msk [vmem:[%s1078_s3 + $0x1c] sm:$0xf] %vm589_vm0, %v694_v52  ;;  %v394_v60 = vadd.f32 %v754_v53, %v948_v18  ;;  %611 = vst.msk [vmem:[%s1078_s3 + $0x54] sm:$0xf] %vm589_vm0, %v708_v55  ;;  %v757_v61 = vadd.f32 %v756_v58, %v755_v54  ;;  %v799_v63 = vadd.f32 %v798_v59, %v797_v57 }
 0x11a   :  { %v450_v62 = vadd.f32 %v796_v56, %v948_v18 }
 0x11b   :  { %v471_v0 = vmax.f32 %v394_v60, 0.0  ;;  %v397_v1 = vadd.f32 %v757_v61, %v948_v18  ;;  %v453_v3 = vadd.f32 %v799_v63, %v948_v18 }
 0x11c   :  { %v485_v2 = vmax.f32 %v450_v62, 0.0 }
 0x11d   :  { %v695_v4 = vpack.c.bf16 %v471_v0, %v471_v0  ;;  %v472_v5 = vmax.f32 %v397_v1, 0.0  ;;  %v758_v6 = vpop.f32.mrb[20].mxu0  ;;  %v486_v8 = vmax.f32 %v453_v3, 0.0  ;;  %v800_v9 = vpop.f32.mrb[20].mxu1 }
 0x11e   :  { %v709_v7 = vpack.c.bf16 %v485_v2, %v485_v2  ;;  %v759_v10 = vpop.f32.mrb[21].mxu0  ;;  %v801_v11 = vpop.f32.mrb[21].mxu1 }
 0x11f   :  { %598 = vst.msk [vmem:[%s1078_s3 + $0x20] sm:$0xf] %vm589_vm0, %v695_v4  ;;  %v696_v12 = vpack.c.bf16 %v472_v5, %v472_v5  ;;  %v760_v13 = vadd.f32 %v759_v10, %v758_v6  ;;  %v761_v14 = vpop.f32.mrb[22].mxu0  ;;  %v710_v15 = vpack.c.bf16 %v486_v8, %v486_v8  ;;  %v802_v16 = vadd.f32 %v801_v11, %v800_v9  ;;  %v803_v17 = vpop.f32.mrb[22].mxu1 }
 0x120   :  { %612 = vst.msk [vmem:[%s1078_s3 + $0x58] sm:$0xf] %vm589_vm0, %v709_v7  ;;  %v762_v19 = vpop.f32.mrb[23].mxu0  ;;  %v804_v20 = vpop.f32.mrb[23].mxu1 }
 0x121   :  { %599 = vst.msk [vmem:[%s1078_s3 + $0x24] sm:$0xf] %vm589_vm0, %v696_v12  ;;  %v402_v21 = vadd.f32 %v760_v13, %v948_v18  ;;  %613 = vst.msk [vmem:[%s1078_s3 + $0x5c] sm:$0xf] %vm589_vm0, %v710_v15  ;;  %v763_v22 = vadd.f32 %v762_v19, %v761_v14  ;;  %v458_v23 = vadd.f32 %v802_v16, %v948_v18 }
 0x123   :  { %v473_v24 = vmax.f32 %v402_v21, 0.0  ;;  %v405_v25 = vadd.f32 %v763_v22, %v948_v18  ;;  %v487_v26 = vmax.f32 %v458_v23, 0.0 }
 0x125   :  { %v697_v27 = vpack.c.bf16 %v473_v24, %v473_v24  ;;  %v474_v28 = vmax.f32 %v405_v25, 0.0  ;;  %v764_v29 = vpop.f32.mrb[24].mxu0  ;;  %v711_v30 = vpack.c.bf16 %v487_v26, %v487_v26 }
 0x126   :  { %v765_v31 = vpop.f32.mrb[25].mxu0 }
 0x127   :  { %600 = vst.msk [vmem:[%s1078_s3 + $0x28] sm:$0xf] %vm589_vm0, %v697_v27  ;;  %v698_v32 = vpack.c.bf16 %v474_v28, %v474_v28  ;;  %614 = vst.msk [vmem:[%s1078_s3 + $0x60] sm:$0xf] %vm589_vm0, %v711_v30  ;;  %v766_v33 = vadd.f32 %v765_v31, %v764_v29  ;;  %v767_v34 = vpop.f32.mrb[26].mxu0 }
 0x128   :  { %v768_v35 = vpop.f32.mrb[27].mxu0 }
 0x129   :  { %601 = vst.msk [vmem:[%s1078_s3 + $0x2c] sm:$0xf] %vm589_vm0, %v698_v32  ;;  %v410_v36 = vadd.f32 %v766_v33, %v948_v18  ;;  %v769_v37 = vadd.f32 %v768_v35, %v767_v34 }
 0x12b   :  { %v475_v38 = vmax.f32 %v410_v36, 0.0  ;;  %v413_v39 = vadd.f32 %v769_v37, %v948_v18 }
 0x12d   :  { %v699_v40 = vpack.c.bf16 %v475_v38, %v475_v38  ;;  %v476_v41 = vmax.f32 %v413_v39, 0.0 }
 0x12f   :  { %602 = vst.msk [vmem:[%s1078_s3 + $0x30] sm:$0xf] %vm589_vm0, %v699_v40  ;;  %v700_v42 = vpack.c.bf16 %v476_v41, %v476_v41 }
 0x131   :  { %603 = vst.msk [vmem:[%s1078_s3 + $0x34] sm:$0xf] %vm589_vm0, %v700_v42 }

// kernel: forward.4
= control target key start
LH: loop header
LB: loop body
LE: loop exit
PB: predicated region body
PF: predicated region fallthrough
CT: control target
= control target key end

     0   :  { %vm444_vm0 = vcmask 519168   ;;  %s761_s1 = inlined_call_operand.vmem [shape: bf16[512,64], index: 1, kind: input, shape index: {}]   ;;  %s762_s0 = inlined_call_operand.vmem [shape: bf16[32,512], index: 0, kind: input, shape index: {}]   ;;  %s763_s2 = inlined_call_operand.vmem [shape: f32[1,64], index: 2, kind: input, shape index: {}]   ;;  %s764_s3 = inlined_call_operand.vmem [shape: bf16[32,64], index: 3, kind: output, shape index: {}]  }
   0x1   :  { %v558_v0 = vld [vmem:[%s761_s1 + $0x40] sm:$0xff]   ;;  %v562_v4 = vld [vmem:[%s761_s1 + $0x48] sm:$0xff]   ;;  %v566_v8 = vld [vmem:[%s761_s1 + $0x50] sm:$0xff]  }
   0x2   :  { %v559_v1 = vld [vmem:[%s761_s1 + $0xc0] sm:$0xff]   ;;  %502 = vmatprep.subr.bf16.mxu0 %v558_v0  ;;  %v563_v5 = vld [vmem:[%s761_s1 + $0xc8] sm:$0xff]   ;;  %v567_v9 = vld [vmem:[%s761_s1 + $0xd0] sm:$0xff]  }
   0x3   :  { %v560_v2 = vld [vmem:[%s761_s1] sm:$0xff]   ;;  %530 = vmatprep.subr.bf16.mxu1 %v559_v1  ;;  %v564_v6 = vld [vmem:[%s761_s1 + $0x8] sm:$0xff]   ;;  %v568_v10 = vld [vmem:[%s761_s1 + $0x10] sm:$0xff]  }
   0x4   :  { %v561_v3 = vld [vmem:[%s761_s1 + $0x80] sm:$0xff]   ;;  %503 = vmatpush3.bf16.msra.mxu0 %v560_v2  ;;  %v565_v7 = vld [vmem:[%s761_s1 + $0x88] sm:$0xff]   ;;  %v569_v11 = vld [vmem:[%s761_s1 + $0x90] sm:$0xff]  }
   0x5   :  { %531 = vmatpush3.bf16.msra.mxu1 %v561_v3  ;;  %504 = vmatprep.subr.bf16.mxu0 %v562_v4  ;;  %v570_v12 = vld [vmem:[%s761_s1 + $0x58] sm:$0xff]   ;;  %v574_v16 = vld [vmem:[%s761_s1 + $0x60] sm:$0xff]   ;;  %v578_v20 = vld [vmem:[%s761_s1 + $0x68] sm:$0xff]  }
   0x6   :  { %532 = vmatprep.subr.bf16.mxu1 %v563_v5  ;;  %v571_v13 = vld [vmem:[%s761_s1 + $0xd8] sm:$0xff]   ;;  %v575_v17 = vld [vmem:[%s761_s1 + $0xe0] sm:$0xff]   ;;  %v579_v21 = vld [vmem:[%s761_s1 + $0xe8] sm:$0xff]  }
   0x7   :  { %v572_v14 = vld [vmem:[%s761_s1 + $0x18] sm:$0xff]   ;;  %v576_v18 = vld [vmem:[%s761_s1 + $0x20] sm:$0xff]   ;;  %v580_v22 = vld [vmem:[%s761_s1 + $0x28] sm:$0xff]  }
   0x8   :  { %505 = vmatpush3.bf16.msra.mxu0 %v564_v6  ;;  %v573_v15 = vld [vmem:[%s761_s1 + $0x98] sm:$0xff]   ;;  %v577_v19 = vld [vmem:[%s761_s1 + $0xa0] sm:$0xff]   ;;  %v581_v23 = vld [vmem:[%s761_s1 + $0xa8] sm:$0xff]  }
   0x9   :  { %533 = vmatpush3.bf16.msra.mxu1 %v565_v7  ;;  %506 = vmatprep.subr.bf16.mxu0 %v566_v8  ;;  %v582_v24 = vld [vmem:[%s761_s1 + $0x70] sm:$0xff]   ;;  %v586_v28 = vld [vmem:[%s761_s1 + $0x78] sm:$0xff]   ;;  %v453_v42 = vld [vmem:[%s763_s2] ss:$0 sm:$0xff] }
   0xa   :  { %534 = vmatprep.subr.bf16.mxu1 %v567_v9  ;;  %v583_v25 = vld [vmem:[%s761_s1 + $0xf0] sm:$0xff]   ;;  %v587_v29 = vld [vmem:[%s761_s1 + $0xf8] sm:$0xff]  }
   0xb   :  { %v584_v26 = vld [vmem:[%s761_s1 + $0x30] sm:$0xff]   ;;  %v588_v30 = vld [vmem:[%s761_s1 + $0x38] sm:$0xff]  }
   0xc   :  { %507 = vmatpush3.bf16.msra.mxu0 %v568_v10  ;;  %v585_v27 = vld [vmem:[%s761_s1 + $0xb0] sm:$0xff]   ;;  %v589_v31 = vld [vmem:[%s761_s1 + $0xb8] sm:$0xff]  }
   0xd   :  { %535 = vmatpush3.bf16.msra.mxu1 %v569_v11  ;;  %508 = vmatprep.subr.bf16.mxu0 %v570_v12  ;;  %v590_v32 = vld [vmem:[%s762_s0] ss:$16 sps:$4 sm:$0xff]   ;;  %v592_v33 = vld [vmem:[%s762_s0 + $0x4] ss:$16 sps:$4 sm:$0xff]   ;;  %v593_v34 = vld [vmem:[%s762_s0 + $0x8] ss:$16 sps:$4 sm:$0xff]  }
   0xe   :  { %536 = vmatprep.subr.bf16.mxu1 %v571_v13  ;;  %v595_v35 = vld [vmem:[%s762_s0 + $0xc] ss:$16 sps:$4 sm:$0xff]   ;;  %358 = vmatprep.mubr.bf16.mxu0 %v592_v33  ;;  %v596_v36 = vld [vmem:[%s762_s0 + $0x24] ss:$16 sps:$4 sm:$0xff]   ;;  %v600_v38 = vld [vmem:[%s762_s0 + $0x20] ss:$16 sps:$4 sm:$0xff]  }
   0xf   :  { %407 = vmatprep.mubr.bf16.mxu1 %v595_v35  ;;  %v598_v37 = vld [vmem:[%s762_s0 + $0x2c] ss:$16 sps:$4 sm:$0xff]   ;;  %v601_v39 = vld [vmem:[%s762_s0 + $0x28] ss:$16 sps:$4 sm:$0xff]  }
  0x10   :  { %509 = vmatpush3.bf16.msra.mxu0 %v572_v14 }
  0x11   :  { %537 = vmatpush3.bf16.msra.mxu1 %v573_v15  ;;  %510 = vmatprep.subr.bf16.mxu0 %v574_v16 }
  0x12   :  { %538 = vmatprep.subr.bf16.mxu1 %v575_v17 }
  0x14   :  { %511 = vmatpush3.bf16.msra.mxu0 %v576_v18 }
  0x15   :  { %539 = vmatpush3.bf16.msra.mxu1 %v577_v19  ;;  %512 = vmatprep.subr.bf16.mxu0 %v578_v20 }
  0x16   :  { %540 = vmatprep.subr.bf16.mxu1 %v579_v21 }
  0x18   :  { %513 = vmatpush3.bf16.msra.mxu0 %v580_v22 }
  0x19   :  { %541 = vmatpush3.bf16.msra.mxu1 %v581_v23  ;;  %514 = vmatprep.subr.bf16.mxu0 %v582_v24 }
  0x1a   :  { %542 = vmatprep.subr.bf16.mxu1 %v583_v25 }
  0x1c   :  { %515 = vmatpush3.bf16.msra.mxu0 %v584_v26 }
  0x1d   :  { %543 = vmatpush3.bf16.msra.mxu1 %v585_v27  ;;  %516 = vmatprep.subr.bf16.mxu0 %v586_v28 }
  0x1e   :  { %544 = vmatprep.subr.bf16.mxu1 %v587_v29 }
  0x20   :  { %517 = vmatpush3.bf16.msra.mxu0 %v588_v30 }
  0x21   :  { %545 = vmatpush3.bf16.msra.mxu1 %v589_v31 }
  0x23   :  { %359 = vmatmul.mubr.bf16.vlgmr.msra.gmra.mrb[0].mxu0 %v590_v32 }
  0x24   :  { %408 = vmatmul.mubr.bf16.vlgmr.msra.gmra.mrb[0].mxu1 %v593_v34  ;;  %366 = vmatprep.mubr.bf16.mxu0 %v596_v36 }
  0x25   :  { %415 = vmatprep.mubr.bf16.mxu1 %v598_v37 }
  0x2b   :  { %367 = vmatmul.mubr.bf16.gmra.mrb[4].mxu0 %v600_v38 }
  0x2c   :  { %416 = vmatmul.mubr.bf16.gmra.mrb[4].mxu1 %v601_v39 }
  0xf6   :  { %v518_v40 = vpop.f32.mrb[0].mxu0 }
  0xf7   :  { %v546_v41 = vpop.f32.mrb[0].mxu1  ;;  %v519_v43 = vpop.f32.mrb[1].mxu0 }
  0xf8   :  { %v520_v44 = vadd.f32 %v519_v43, %v518_v40  ;;  %v547_v45 = vpop.f32.mrb[1].mxu1  ;;  %v521_v46 = vpop.f32.mrb[2].mxu0 }
  0xf9   :  { %v548_v47 = vadd.f32 %v547_v45, %v546_v41  ;;  %v549_v48 = vpop.f32.mrb[2].mxu1  ;;  %v522_v49 = vpop.f32.mrb[3].mxu0 }
  0xfa   :  { %v361_v50 = vadd.f32 %v520_v44, %v453_v42  ;;  %v523_v51 = vadd.f32 %v522_v49, %v521_v46  ;;  %v550_v52 = vpop.f32.mrb[3].mxu1 }
  0xfb   :  { %v551_v53 = vadd.f32 %v550_v52, %v549_v48 }
  0xfc   :  { %v410_v54 = vadd.f32 %v548_v47, %v361_v50  ;;  %v364_v55 = vadd.f32 %v523_v51, %v453_v42 }
  0xfe   :  { %v424_v56 = vmax.f32 %v410_v54, 0.0  ;;  %v413_v57 = vadd.f32 %v551_v53, %v364_v55  ;;  %v524_v58 = vpop.f32.mrb[4].mxu0 }
  0xff   :  { %v552_v59 = vpop.f32.mrb[4].mxu1  ;;  %v525_v60 = vpop.f32.mrb[5].mxu0 }
 0x100   :  { %v498_v61 = vpack.c.bf16 %v424_v56, %v424_v56  ;;  %v425_v62 = vmax.f32 %v413_v57, 0.0  ;;  %v526_v63 = vadd.f32 %v525_v60, %v524_v58  ;;  %v553_v0 = vpop.f32.mrb[5].mxu1  ;;  %v527_v1 = vpop.f32.mrb[6].mxu0 }
 0x101   :  { %v554_v2 = vadd.f32 %v553_v0, %v552_v59  ;;  %v555_v3 = vpop.f32.mrb[6].mxu1  ;;  %v528_v4 = vpop.f32.mrb[7].mxu0 }
 0x102   :  { %445 = vst.msk [vmem:[%s764_s3] sm:$0xf] %vm444_vm0, %v498_v61  ;;  %v499_v5 = vpack.c.bf16 %v425_v62, %v425_v62  ;;  %v369_v6 = vadd.f32 %v526_v63, %v453_v42  ;;  %v529_v7 = vadd.f32 %v528_v4, %v527_v1  ;;  %v556_v8 = vpop.f32.mrb[7].mxu1 }
 0x103   :  { %v557_v9 = vadd.f32 %v556_v8, %v555_v3 }
 0x104   :  { %446 = vst.msk [vmem:[%s764_s3 + $0x4] sm:$0xf] %vm444_vm0, %v499_v5  ;;  %v418_v10 = vadd.f32 %v554_v2, %v369_v6  ;;  %v372_v11 = vadd.f32 %v529_v7, %v453_v42 }
 0x106   :  { %v426_v12 = vmax.f32 %v418_v10, 0.0  ;;  %v421_v13 = vadd.f32 %v557_v9, %v372_v11 }
 0x108   :  { %v500_v14 = vpack.c.bf16 %v426_v12, %v426_v12  ;;  %v427_v15 = vmax.f32 %v421_v13, 0.0 }
 0x10a   :  { %447 = vst.msk [vmem:[%s764_s3 + $0x8] sm:$0xf] %vm444_vm0, %v500_v14  ;;  %v501_v16 = vpack.c.bf16 %v427_v15, %v427_v15 }
 0x10c   :  { %448 = vst.msk [vmem:[%s764_s3 + $0xc] sm:$0xf] %vm444_vm0, %v501_v16 }

// kernel: forward.5
= control target key start
LH: loop header
LB: loop body
LE: loop exit
PB: predicated region body
PF: predicated region fallthrough
CT: control target
= control target key end

     0   :  { %s3294_s1 = inlined_call_operand.vmem [shape: bf16[1024,256], index: 1, kind: input, shape index: {}]   ;;  %s3295_s0 = inlined_call_operand.vmem [shape: bf16[16,1024], index: 0, kind: input, shape index: {}]   ;;  %s3296_s3 = inlined_call_operand.vmem [shape: bf16[256,512], index: 3, kind: input, shape index: {}]   ;;  %s3297_s5 = inlined_call_operand.vmem [shape: bf16[512,128], index: 5, kind: input, shape index: {}]   ;;  %s3298_s2 = inlined_call_operand.vmem [shape: f32[1,256], index: 2, kind: input, shape index: {}]   ;;  %s3299_s4 = inlined_call_operand.vmem [shape: f32[1,512], index: 4, kind: input, shape index: {}]   ;;  %s3300_s6 = inlined_call_operand.vmem [shape: f32[1,128], index: 6, kind: input, shape index: {}]   ;;  %s3301_s7 = inlined_call_operand.vmem [shape: f32[16,128], index: 7, kind: output, shape index: {}]  }
   0x1   :  { %v2181_v0 = vld [vmem:[%s3294_s1 + $0x4] ss:$8 sps:$4 sm:$0xff]   ;;  %v2183_v1 = vld [vmem:[%s3294_s1] ss:$8 sps:$4 sm:$0xff]   ;;  %v2184_v2 = vld [vmem:[%s3294_s1 + $0x14] ss:$8 sps:$4 sm:$0xff]  }
   0x2   :  { %855 = vmatprep.subr.bf16.mxu0 %v2181_v0  ;;  %v2186_v3 = vld [vmem:[%s3294_s1 + $0x10] ss:$8 sps:$4 sm:$0xff]   ;;  %v2187_v4 = vld [vmem:[%s3294_s1 + $0x24] ss:$8 sps:$4 sm:$0xff]   ;;  %v2189_v5 = vld [vmem:[%s3294_s1 + $0x20] ss:$8 sps:$4 sm:$0xff]  }
   0x3   :  { %856 = vmatpush1.bf16.msra.mxu0 %v2183_v1  ;;  %v2190_v6 = vld [vmem:[%s3294_s1 + $0x34] ss:$8 sps:$4 sm:$0xff]   ;;  %v2192_v7 = vld [vmem:[%s3294_s1 + $0x30] ss:$8 sps:$4 sm:$0xff]   ;;  %v2193_v8 = vld [vmem:[%s3294_s1 + $0x44] ss:$8 sps:$4 sm:$0xff]  }
   0x4   :  { %857 = vmatprep.subr.bf16.mxu0 %v2184_v2  ;;  %v2195_v9 = vld [vmem:[%s3294_s1 + $0x40] ss:$8 sps:$4 sm:$0xff]   ;;  %v2196_v10 = vld [vmem:[%s3294_s1 + $0x54] ss:$8 sps:$4 sm:$0xff]   ;;  %v2198_v11 = vld [vmem:[%s3294_s1 + $0x50] ss:$8 sps:$4 sm:$0xff]  }
   0x5   :  { %v2199_v12 = vld [vmem:[%s3294_s1 + $0x64] ss:$8 sps:$4 sm:$0xff]   ;;  %v2201_v16 = vld [vmem:[%s3294_s1 + $0x60] ss:$8 sps:$4 sm:$0xff]   ;;  %v2202_v17 = vld [vmem:[%s3294_s1 + $0x74] ss:$8 sps:$4 sm:$0xff]  }
   0x6   :  { %v27_v13 = vld [vmem:[%s3295_s0] sm:$0xff]  ;;  %v2204_v18 = vld [vmem:[%s3294_s1 + $0x70] ss:$8 sps:$4 sm:$0xff]   ;;  %v2208_v21 = vld [vmem:[%s3294_s1 + $0x94] ss:$8 sps:$4 sm:$0xff]  }
   0x7   :  { %858 = vmatpush1.bf16.msra.mxu0 %v2186_v3  ;;  %v31_v14 = vld [vmem:[%s3295_s0 + $0x20] sm:$0xff]  ;;  %v2210_v22 = vld [vmem:[%s3294_s1 + $0x90] ss:$8 sps:$4 sm:$0xff]   ;;  %v2214_v25 = vld [vmem:[%s3294_s1 + $0xb4] ss:$8 sps:$4 sm:$0xff]  }
   0x8   :  { %859 = vmatprep.subr.bf16.mxu0 %v2187_v4  ;;  %v1889_v15 = vcombine.high %v27_v13, %v31_v14  ;;  %v2205_v19 = vld [vmem:[%s3294_s1 + $0x84] ss:$8 sps:$4 sm:$0xff]   ;;  %v2207_v20 = vld [vmem:[%s3294_s1 + $0x80] ss:$8 sps:$4 sm:$0xff]   ;;  %v2216_v26 = vld [vmem:[%s3294_s1 + $0xb0] ss:$8 sps:$4 sm:$0xff]   ;;  %v1888_v38 = vcombine.low %v27_v13, %v31_v14 }
   0x9   :  { %v2211_v23 = vld [vmem:[%s3294_s1 + $0xa4] ss:$8 sps:$4 sm:$0xff]   ;;  %v2213_v24 = vld [vmem:[%s3294_s1 + $0xa0] ss:$8 sps:$4 sm:$0xff]   ;;  %v2220_v29 = vld [vmem:[%s3294_s1 + $0xd4] ss:$8 sps:$4 sm:$0xff]  }
   0xa   :  { %887 = vmatprep.mubr.bf16.mxu0 %v1889_v15  ;;  %v2217_v27 = vld [vmem:[%s3294_s1 + $0xc4] ss:$8 sps:$4 sm:$0xff]   ;;  %v2219_v28 = vld [vmem:[%s3294_s1 + $0xc0] ss:$8 sps:$4 sm:$0xff]   ;;  %v2222_v30 = vld [vmem:[%s3294_s1 + $0xd0] ss:$8 sps:$4 sm:$0xff]  }
   0xb   :  { %860 = vmatpush1.bf16.msra.mxu0 %v2189_v5  ;;  %v2223_v31 = vld [vmem:[%s3294_s1 + $0xe4] ss:$8 sps:$4 sm:$0xff]   ;;  %v2225_v32 = vld [vmem:[%s3294_s1 + $0xe0] ss:$8 sps:$4 sm:$0xff]   ;;  %v2226_v33 = vld [vmem:[%s3294_s1 + $0xf4] ss:$8 sps:$4 sm:$0xff]  }
   0xc   :  { %861 = vmatprep.subr.bf16.mxu0 %v2190_v6  ;;  %v2228_v34 = vld [vmem:[%s3294_s1 + $0xf0] ss:$8 sps:$4 sm:$0xff]   ;;  %v2231_v35 = vld [vmem:[%s3294_s1 + $0x104] ss:$8 sps:$4 sm:$0xff]   ;;  %v2229_v39 = vld [vmem:[%s3294_s1 + $0x100] ss:$8 sps:$4 sm:$0xff]  }
   0xd   :  { %v2649_v36 = vld [vmem:[%s3295_s0 + $0x8] sm:$0xff]  ;;  %v2234_v41 = vld [vmem:[%s3294_s1 + $0x114] ss:$8 sps:$4 sm:$0xff]   ;;  %v2232_v42 = vld [vmem:[%s3294_s1 + $0x110] ss:$8 sps:$4 sm:$0xff]  }
   0xe   :  { %v2654_v37 = vld [vmem:[%s3295_s0 + $0x28] sm:$0xff]  ;;  %v2240_v45 = vld [vmem:[%s3294_s1 + $0x134] ss:$8 sps:$4 sm:$0xff]   ;;  %v2238_v46 = vld [vmem:[%s3294_s1 + $0x130] ss:$8 sps:$4 sm:$0xff]  }
   0xf   :  { %862 = vmatpush1.bf16.msra.mxu0 %v2192_v7  ;;  %v1891_v40 = vcombine.high %v2649_v36, %v2654_v37  ;;  %v2237_v43 = vld [vmem:[%s3294_s1 + $0x124] ss:$8 sps:$4 sm:$0xff]   ;;  %v2235_v44 = vld [vmem:[%s3294_s1 + $0x120] ss:$8 sps:$4 sm:$0xff]   ;;  %v2246_v49 = vld [vmem:[%s3294_s1 + $0x154] ss:$8 sps:$4 sm:$0xff]  }
  0x10   :  { %863 = vmatprep.subr.bf16.mxu0 %v2193_v8  ;;  %v2243_v47 = vld [vmem:[%s3294_s1 + $0x144] ss:$8 sps:$4 sm:$0xff]   ;;  %v2241_v48 = vld [vmem:[%s3294_s1 + $0x140] ss:$8 sps:$4 sm:$0xff]   ;;  %v2244_v50 = vld [vmem:[%s3294_s1 + $0x150] ss:$8 sps:$4 sm:$0xff]  }
  0x11   :  { %v2249_v51 = vld [vmem:[%s3294_s1 + $0x164] ss:$8 sps:$4 sm:$0xff]   ;;  %v2247_v52 = vld [vmem:[%s3294_s1 + $0x160] ss:$8 sps:$4 sm:$0xff]   ;;  %v2252_v53 = vld [vmem:[%s3294_s1 + $0x174] ss:$8 sps:$4 sm:$0xff]  }
  0x12   :  { %v2250_v54 = vld [vmem:[%s3294_s1 + $0x170] ss:$8 sps:$4 sm:$0xff]   ;;  %v2255_v55 = vld [vmem:[%s3294_s1 + $0x184] ss:$8 sps:$4 sm:$0xff]   ;;  %v2253_v56 = vld [vmem:[%s3294_s1 + $0x180] ss:$8 sps:$4 sm:$0xff]  }
  0x13   :  { %864 = vmatpush1.bf16.msra.mxu0 %v2195_v9  ;;  %v2258_v57 = vld [vmem:[%s3294_s1 + $0x194] ss:$8 sps:$4 sm:$0xff]   ;;  %v2256_v58 = vld [vmem:[%s3294_s1 + $0x190] ss:$8 sps:$4 sm:$0xff]   ;;  %v2261_v59 = vld [vmem:[%s3294_s1 + $0x1a4] ss:$8 sps:$4 sm:$0xff]  }
  0x14   :  { %865 = vmatprep.subr.bf16.mxu0 %v2196_v10  ;;  %v2259_v60 = vld [vmem:[%s3294_s1 + $0x1a0] ss:$8 sps:$4 sm:$0xff]   ;;  %v2264_v61 = vld [vmem:[%s3294_s1 + $0x1b4] ss:$8 sps:$4 sm:$0xff]   ;;  %v2262_v62 = vld [vmem:[%s3294_s1 + $0x1b0] ss:$8 sps:$4 sm:$0xff]   ;;  %v1890_v10 = vcombine.low %v2649_v36, %v2654_v37 }
  0x15   :  { %v2267_v63 = vld [vmem:[%s3294_s1 + $0x1c4] ss:$8 sps:$4 sm:$0xff]   ;;  %v2265_v0 = vld [vmem:[%s3294_s1 + $0x1c0] ss:$8 sps:$4 sm:$0xff]   ;;  %v2270_v1 = vld [vmem:[%s3294_s1 + $0x1d4] ss:$8 sps:$4 sm:$0xff]  }
  0x16   :  { %v2268_v2 = vld [vmem:[%s3294_s1 + $0x1d0] ss:$8 sps:$4 sm:$0xff]   ;;  %v2273_v3 = vld [vmem:[%s3294_s1 + $0x1e4] ss:$8 sps:$4 sm:$0xff]   ;;  %v2271_v4 = vld [vmem:[%s3294_s1 + $0x1e0] ss:$8 sps:$4 sm:$0xff]  }
  0x17   :  { %866 = vmatpush1.bf16.msra.mxu0 %v2198_v11  ;;  %v2276_v5 = vld [vmem:[%s3294_s1 + $0x1f4] ss:$8 sps:$4 sm:$0xff]   ;;  %v2274_v6 = vld [vmem:[%s3294_s1 + $0x1f0] ss:$8 sps:$4 sm:$0xff]   ;;  %v2279_v7 = vld [vmem:[%s3294_s1 + $0x204] ss:$8 sps:$4 sm:$0xff]  }
  0x18   :  { %867 = vmatprep.subr.bf16.mxu0 %v2199_v12  ;;  %v2757_v8 = vld [vmem:[%s3295_s0 + $0x10] sm:$0xff]  ;;  %v2277_v11 = vld [vmem:[%s3294_s1 + $0x200] ss:$8 sps:$4 sm:$0xff]   ;;  %v2285_v15 = vld [vmem:[%s3294_s1 + $0x224] ss:$8 sps:$4 sm:$0xff]  }
  0x19   :  { %v2762_v9 = vld [vmem:[%s3295_s0 + $0x30] sm:$0xff] }
  0x1a   :  { %v1893_v12 = vcombine.high %v2757_v8, %v2762_v9  ;;  %v2282_v13 = vld [vmem:[%s3294_s1 + $0x214] ss:$8 sps:$4 sm:$0xff]   ;;  %v2280_v14 = vld [vmem:[%s3294_s1 + $0x210] ss:$8 sps:$4 sm:$0xff]  }
  0x1b   :  { %868 = vmatpush1.bf16.msra.mxu0 %v2201_v16  ;;  %v2373_v16 = vld [vmem:[%s3296_s3 + $0x4] ss:$16 sps:$4 sm:$0xff]   ;;  %v2390_v36 = vld [vmem:[%s3296_s3 + $0xa0] ss:$16 sps:$4 sm:$0xff]  }
  0x1c   :  { %869 = vmatprep.subr.bf16.mxu0 %v2202_v17  ;;  %v2375_v17 = vld [vmem:[%s3296_s3] ss:$16 sps:$4 sm:$0xff]   ;;  %1439 = vmatprep.subr.bf16.mxu1 %v2373_v16  ;;  %v2391_v37 = vld [vmem:[%s3296_s3 + $0xc4] ss:$16 sps:$4 sm:$0xff]  }
  0x1d   :  { %1440 = vmatpush1.bf16.msra.mxu1 %v2375_v17  ;;  %v2328_v16 = vld [vmem:[%s3294_s1 + $0x310] ss:$8 sps:$4 sm:$0xff]   ;;  %v2336_v17 = vld [vmem:[%s3294_s1 + $0x334] ss:$8 sps:$4 sm:$0xff]  }
  0x1f   :  { %870 = vmatpush1.bf16.msra.mxu0 %v2204_v18  ;;  %v2376_v18 = vld [vmem:[%s3296_s3 + $0x24] ss:$16 sps:$4 sm:$0xff]  }
  0x20   :  { %871 = vmatprep.subr.bf16.mxu0 %v2205_v19  ;;  %v2283_v19 = vld [vmem:[%s3294_s1 + $0x220] ss:$8 sps:$4 sm:$0xff]   ;;  %1441 = vmatprep.subr.bf16.mxu1 %v2376_v18  ;;  %v2334_v18 = vld [vmem:[%s3294_s1 + $0x330] ss:$8 sps:$4 sm:$0xff]  }
  0x23   :  { %872 = vmatpush1.bf16.msra.mxu0 %v2207_v20  ;;  %v2378_v20 = vld [vmem:[%s3296_s3 + $0x20] ss:$16 sps:$4 sm:$0xff]  }
  0x24   :  { %873 = vmatprep.subr.bf16.mxu0 %v2208_v21  ;;  %v2379_v21 = vld [vmem:[%s3296_s3 + $0x44] ss:$16 sps:$4 sm:$0xff]   ;;  %1442 = vmatpush1.bf16.msra.mxu1 %v2378_v20  ;;  %v2337_v20 = vld [vmem:[%s3294_s1 + $0x340] ss:$8 sps:$4 sm:$0xff]  }
  0x25   :  { %1443 = vmatprep.subr.bf16.mxu1 %v2379_v21  ;;  %v2342_v21 = vld [vmem:[%s3294_s1 + $0x354] ss:$8 sps:$4 sm:$0xff]  }
  0x27   :  { %874 = vmatpush1.bf16.msra.mxu0 %v2210_v22  ;;  %v2288_v22 = vld [vmem:[%s3294_s1 + $0x234] ss:$8 sps:$4 sm:$0xff]  }
  0x28   :  { %875 = vmatprep.subr.bf16.mxu0 %v2211_v23  ;;  %v2286_v23 = vld [vmem:[%s3294_s1 + $0x230] ss:$8 sps:$4 sm:$0xff]  }
  0x2b   :  { %876 = vmatpush1.bf16.msra.mxu0 %v2213_v24  ;;  %v2381_v24 = vld [vmem:[%s3296_s3 + $0x40] ss:$16 sps:$4 sm:$0xff]  }
  0x2c   :  { %877 = vmatprep.subr.bf16.mxu0 %v2214_v25  ;;  %v2382_v25 = vld [vmem:[%s3296_s3 + $0x64] ss:$16 sps:$4 sm:$0xff]   ;;  %1444 = vmatpush1.bf16.msra.mxu1 %v2381_v24  ;;  %v2343_v24 = vld [vmem:[%s3294_s1 + $0x360] ss:$8 sps:$4 sm:$0xff]  }
  0x2d   :  { %1445 = vmatprep.subr.bf16.mxu1 %v2382_v25  ;;  %v2348_v25 = vld [vmem:[%s3294_s1 + $0x374] ss:$8 sps:$4 sm:$0xff]  }
  0x2f   :  { %878 = vmatpush1.bf16.msra.mxu0 %v2216_v26  ;;  %v2291_v26 = vld [vmem:[%s3294_s1 + $0x244] ss:$8 sps:$4 sm:$0xff]  }
  0x30   :  { %879 = vmatprep.subr.bf16.mxu0 %v2217_v27  ;;  %v2289_v27 = vld [vmem:[%s3294_s1 + $0x240] ss:$8 sps:$4 sm:$0xff]  }
  0x33   :  { %880 = vmatpush1.bf16.msra.mxu0 %v2219_v28  ;;  %v2384_v28 = vld [vmem:[%s3296_s3 + $0x60] ss:$16 sps:$4 sm:$0xff]  }
  0x34   :  { %881 = vmatprep.subr.bf16.mxu0 %v2220_v29  ;;  %v2385_v29 = vld [vmem:[%s3296_s3 + $0x84] ss:$16 sps:$4 sm:$0xff]   ;;  %1446 = vmatpush1.bf16.msra.mxu1 %v2384_v28  ;;  %v2349_v28 = vld [vmem:[%s3294_s1 + $0x380] ss:$8 sps:$4 sm:$0xff]  }
  0x35   :  { %1447 = vmatprep.subr.bf16.mxu1 %v2385_v29  ;;  %v2354_v29 = vld [vmem:[%s3294_s1 + $0x394] ss:$8 sps:$4 sm:$0xff]  }
  0x37   :  { %882 = vmatpush1.bf16.msra.mxu0 %v2222_v30  ;;  %v2294_v30 = vld [vmem:[%s3294_s1 + $0x254] ss:$8 sps:$4 sm:$0xff]  }
  0x38   :  { %883 = vmatprep.subr.bf16.mxu0 %v2223_v31  ;;  %v2292_v31 = vld [vmem:[%s3294_s1 + $0x250] ss:$8 sps:$4 sm:$0xff]  }
  0x3b   :  { %884 = vmatpush1.bf16.msra.mxu0 %v2225_v32  ;;  %v2387_v32 = vld [vmem:[%s3296_s3 + $0x80] ss:$16 sps:$4 sm:$0xff]  }
  0x3c   :  { %885 = vmatprep.subr.bf16.mxu0 %v2226_v33  ;;  %v2388_v33 = vld [vmem:[%s3296_s3 + $0xa4] ss:$16 sps:$4 sm:$0xff]   ;;  %1448 = vmatpush1.bf16.msra.mxu1 %v2387_v32  ;;  %v2355_v32 = vld [vmem:[%s3294_s1 + $0x3a0] ss:$8 sps:$4 sm:$0xff]  }
  0x3d   :  { %1449 = vmatprep.subr.bf16.mxu1 %v2388_v33  ;;  %v2360_v33 = vld [vmem:[%s3294_s1 + $0x3b4] ss:$8 sps:$4 sm:$0xff]  }
  0x3f   :  { %886 = vmatpush1.bf16.msra.mxu0 %v2228_v34  ;;  %v2297_v34 = vld [vmem:[%s3294_s1 + $0x264] ss:$8 sps:$4 sm:$0xff]  }
  0x40   :  { %898 = vmatprep.subr.bf16.mxu0 %v2231_v35  ;;  %v2295_v35 = vld [vmem:[%s3294_s1 + $0x260] ss:$8 sps:$4 sm:$0xff]   ;;  %1450 = vmatpush1.bf16.msra.mxu1 %v2390_v36 }
  0x41   :  { %1451 = vmatprep.subr.bf16.mxu1 %v2391_v37  ;;  %v2361_v36 = vld [vmem:[%s3294_s1 + $0x3c0] ss:$8 sps:$4 sm:$0xff]   ;;  %v2366_v37 = vld [vmem:[%s3294_s1 + $0x3d4] ss:$8 sps:$4 sm:$0xff]  }
  0x42   :  { %888 = vmatmul.mubr.bf16.vlgmr.msra.gmra.mrb[0].mxu0 %v1888_v38  ;;  %v2300_v38 = vld [vmem:[%s3294_s1 + $0x274] ss:$8 sps:$4 sm:$0xff]  }
  0x43   :  { %899 = vmatpush1.bf16.msra.mxu0 %v2229_v39  ;;  %930 = vmatprep.mubr.bf16.mxu0 %v1891_v40  ;;  %v2393_v39 = vld [vmem:[%s3296_s3 + $0xc0] ss:$16 sps:$4 sm:$0xff]  }
  0x44   :  { %900 = vmatprep.subr.bf16.mxu0 %v2234_v41  ;;  %v2298_v40 = vld [vmem:[%s3294_s1 + $0x270] ss:$8 sps:$4 sm:$0xff]   ;;  %v2394_v41 = vld [vmem:[%s3296_s3 + $0xe4] ss:$16 sps:$4 sm:$0xff]   ;;  %1452 = vmatpush1.bf16.msra.mxu1 %v2393_v39 }
  0x45   :  { %1453 = vmatprep.subr.bf16.mxu1 %v2394_v41  ;;  %v2369_v39 = vld [vmem:[%s3294_s1 + $0x3e4] ss:$8 sps:$4 sm:$0xff]   ;;  %v2372_v41 = vld [vmem:[%s3294_s1 + $0x3f4] ss:$8 sps:$4 sm:$0xff]  }
  0x47   :  { %901 = vmatpush1.bf16.msra.mxu0 %v2232_v42  ;;  %v2303_v42 = vld [vmem:[%s3294_s1 + $0x284] ss:$8 sps:$4 sm:$0xff]  }
  0x48   :  { %902 = vmatprep.subr.bf16.mxu0 %v2237_v43  ;;  %v2396_v43 = vld [vmem:[%s3296_s3 + $0xe0] ss:$16 sps:$4 sm:$0xff]  }
  0x49   :  { %1454 = vmatpush1.bf16.msra.mxu1 %v2396_v43 }
  0x4b   :  { %903 = vmatpush1.bf16.msra.mxu0 %v2235_v44  ;;  %v2301_v44 = vld [vmem:[%s3294_s1 + $0x280] ss:$8 sps:$4 sm:$0xff]  }
  0x4c   :  { %904 = vmatprep.subr.bf16.mxu0 %v2240_v45  ;;  %v2397_v45 = vld [vmem:[%s3296_s3 + $0x104] ss:$16 sps:$4 sm:$0xff]  }
  0x4d   :  { %1455 = vmatprep.subr.bf16.mxu1 %v2397_v45  ;;  %v2417_v45 = vld [vmem:[%s3296_s3 + $0x1c0] ss:$16 sps:$4 sm:$0xff]  }
  0x4f   :  { %905 = vmatpush1.bf16.msra.mxu0 %v2238_v46  ;;  %v2306_v46 = vld [vmem:[%s3294_s1 + $0x294] ss:$8 sps:$4 sm:$0xff]  }
  0x50   :  { %906 = vmatprep.subr.bf16.mxu0 %v2243_v47  ;;  %v2399_v47 = vld [vmem:[%s3296_s3 + $0x100] ss:$16 sps:$4 sm:$0xff]  }
  0x51   :  { %1456 = vmatpush1.bf16.msra.mxu1 %v2399_v47  ;;  %v2420_v47 = vld [vmem:[%s3296_s3 + $0x1e0] ss:$16 sps:$4 sm:$0xff]  }
  0x53   :  { %907 = vmatpush1.bf16.msra.mxu0 %v2241_v48  ;;  %v2304_v48 = vld [vmem:[%s3294_s1 + $0x290] ss:$8 sps:$4 sm:$0xff]  }
  0x54   :  { %908 = vmatprep.subr.bf16.mxu0 %v2246_v49  ;;  %v2400_v49 = vld [vmem:[%s3296_s3 + $0x124] ss:$16 sps:$4 sm:$0xff]  }
  0x55   :  { %1457 = vmatprep.subr.bf16.mxu1 %v2400_v49  ;;  %v165_v49 = vlaneseq }
  0x57   :  { %909 = vmatpush1.bf16.msra.mxu0 %v2244_v50  ;;  %v2309_v50 = vld [vmem:[%s3294_s1 + $0x2a4] ss:$8 sps:$4 sm:$0xff]  }
  0x58   :  { %910 = vmatprep.subr.bf16.mxu0 %v2249_v51  ;;  %v2402_v51 = vld [vmem:[%s3296_s3 + $0x120] ss:$16 sps:$4 sm:$0xff]  }
  0x59   :  { %1458 = vmatpush1.bf16.msra.mxu1 %v2402_v51 }
  0x5b   :  { %911 = vmatpush1.bf16.msra.mxu0 %v2247_v52  ;;  %v2307_v52 = vld [vmem:[%s3294_s1 + $0x2a0] ss:$8 sps:$4 sm:$0xff]  }
  0x5c   :  { %912 = vmatprep.subr.bf16.mxu0 %v2252_v53  ;;  %v2403_v53 = vld [vmem:[%s3296_s3 + $0x144] ss:$16 sps:$4 sm:$0xff]  }
  0x5d   :  { %1459 = vmatprep.subr.bf16.mxu1 %v2403_v53 }
  0x5f   :  { %913 = vmatpush1.bf16.msra.mxu0 %v2250_v54  ;;  %v2312_v54 = vld [vmem:[%s3294_s1 + $0x2b4] ss:$8 sps:$4 sm:$0xff]  }
  0x60   :  { %914 = vmatprep.subr.bf16.mxu0 %v2255_v55  ;;  %v2405_v55 = vld [vmem:[%s3296_s3 + $0x140] ss:$16 sps:$4 sm:$0xff]  }
  0x61   :  { %1460 = vmatpush1.bf16.msra.mxu1 %v2405_v55 }
  0x63   :  { %915 = vmatpush1.bf16.msra.mxu0 %v2253_v56  ;;  %v2310_v56 = vld [vmem:[%s3294_s1 + $0x2b0] ss:$8 sps:$4 sm:$0xff]  }
  0x64   :  { %916 = vmatprep.subr.bf16.mxu0 %v2258_v57  ;;  %v2406_v57 = vld [vmem:[%s3296_s3 + $0x164] ss:$16 sps:$4 sm:$0xff]  }
  0x65   :  { %1461 = vmatprep.subr.bf16.mxu1 %v2406_v57 }
  0x67   :  { %917 = vmatpush1.bf16.msra.mxu0 %v2256_v58  ;;  %v2315_v58 = vld [vmem:[%s3294_s1 + $0x2c4] ss:$8 sps:$4 sm:$0xff]  }
  0x68   :  { %918 = vmatprep.subr.bf16.mxu0 %v2261_v59  ;;  %v2408_v59 = vld [vmem:[%s3296_s3 + $0x160] ss:$16 sps:$4 sm:$0xff]  }
  0x69   :  { %1462 = vmatpush1.bf16.msra.mxu1 %v2408_v59 }
  0x6b   :  { %919 = vmatpush1.bf16.msra.mxu0 %v2259_v60  ;;  %v2313_v60 = vld [vmem:[%s3294_s1 + $0x2c0] ss:$8 sps:$4 sm:$0xff]  }
  0x6c   :  { %920 = vmatprep.subr.bf16.mxu0 %v2264_v61  ;;  %v2409_v61 = vld [vmem:[%s3296_s3 + $0x184] ss:$16 sps:$4 sm:$0xff]  }
  0x6d   :  { %1463 = vmatprep.subr.bf16.mxu1 %v2409_v61 }
  0x6f   :  { %921 = vmatpush1.bf16.msra.mxu0 %v2262_v62  ;;  %v2318_v62 = vld [vmem:[%s3294_s1 + $0x2d4] ss:$8 sps:$4 sm:$0xff]  }
  0x70   :  { %922 = vmatprep.subr.bf16.mxu0 %v2267_v63  ;;  %v2411_v63 = vld [vmem:[%s3296_s3 + $0x180] ss:$16 sps:$4 sm:$0xff]  }
  0x71   :  { %1464 = vmatpush1.bf16.msra.mxu1 %v2411_v63 }
  0x73   :  { %923 = vmatpush1.bf16.msra.mxu0 %v2265_v0  ;;  %v2316_v0 = vld [vmem:[%s3294_s1 + $0x2d0] ss:$8 sps:$4 sm:$0xff]  }
  0x74   :  { %924 = vmatprep.subr.bf16.mxu0 %v2270_v1  ;;  %v2412_v1 = vld [vmem:[%s3296_s3 + $0x1a4] ss:$16 sps:$4 sm:$0xff]  }
  0x75   :  { %1465 = vmatprep.subr.bf16.mxu1 %v2412_v1 }
  0x77   :  { %925 = vmatpush1.bf16.msra.mxu0 %v2268_v2  ;;  %v2321_v2 = vld [vmem:[%s3294_s1 + $0x2e4] ss:$8 sps:$4 sm:$0xff]  }
  0x78   :  { %926 = vmatprep.subr.bf16.mxu0 %v2273_v3  ;;  %v2414_v3 = vld [vmem:[%s3296_s3 + $0x1a0] ss:$16 sps:$4 sm:$0xff]  }
  0x79   :  { %1466 = vmatpush1.bf16.msra.mxu1 %v2414_v3 }
  0x7b   :  { %927 = vmatpush1.bf16.msra.mxu0 %v2271_v4  ;;  %v2319_v4 = vld [vmem:[%s3294_s1 + $0x2e0] ss:$8 sps:$4 sm:$0xff]  }
  0x7c   :  { %928 = vmatprep.subr.bf16.mxu0 %v2276_v5  ;;  %v2324_v5 = vld [vmem:[%s3294_s1 + $0x2f4] ss:$8 sps:$4 sm:$0xff]  }
  0x7f   :  { %929 = vmatpush1.bf16.msra.mxu0 %v2274_v6  ;;  %v2322_v6 = vld [vmem:[%s3294_s1 + $0x2f0] ss:$8 sps:$4 sm:$0xff]  }
  0x80   :  { %941 = vmatprep.subr.bf16.mxu0 %v2279_v7  ;;  %v2327_v7 = vld [vmem:[%s3294_s1 + $0x304] ss:$8 sps:$4 sm:$0xff]  }
  0x82   :  { %931 = vmatmul.mubr.bf16.vlgmr.msra.gmra.mrb[0].mxu0 %v1890_v10  ;;  %v2951_v10 = vld [vmem:[%s3295_s0 + $0x18] sm:$0xff] }
  0x83   :  { %942 = vmatpush1.bf16.msra.mxu0 %v2277_v11  ;;  %973 = vmatprep.mubr.bf16.mxu0 %v1893_v12  ;;  %v2956_v11 = vld [vmem:[%s3295_s0 + $0x38] sm:$0xff]  ;;  %v1892_v12 = vcombine.low %v2757_v8, %v2762_v9  ;;  %v2333_v8 = vld [vmem:[%s3294_s1 + $0x324] ss:$8 sps:$4 sm:$0xff]   ;;  %v2331_v9 = vld [vmem:[%s3294_s1 + $0x320] ss:$8 sps:$4 sm:$0xff]  }
  0x84   :  { %943 = vmatprep.subr.bf16.mxu0 %v2282_v13  ;;  %v2325_v13 = vld [vmem:[%s3294_s1 + $0x300] ss:$8 sps:$4 sm:$0xff]   ;;  %v1894_v43 = vcombine.low %v2951_v10, %v2956_v11 }
  0x87   :  { %944 = vmatpush1.bf16.msra.mxu0 %v2280_v14  ;;  %v1895_v14 = vcombine.high %v2951_v10, %v2956_v11  ;;  %v2424_v10 = vld [vmem:[%s3296_s3 + $0x28] ss:$16 sps:$4 sm:$0xff]   ;;  %v2429_v11 = vld [vmem:[%s3296_s3 + $0x4c] ss:$16 sps:$4 sm:$0xff]  }
  0x88   :  { %945 = vmatprep.subr.bf16.mxu0 %v2285_v15  ;;  %v2330_v15 = vld [vmem:[%s3294_s1 + $0x314] ss:$8 sps:$4 sm:$0xff]  }
  0x8b   :  { %946 = vmatpush1.bf16.msra.mxu0 %v2283_v19  ;;  %v2339_v19 = vld [vmem:[%s3294_s1 + $0x344] ss:$8 sps:$4 sm:$0xff]  }
  0x8c   :  { %947 = vmatprep.subr.bf16.mxu0 %v2288_v22  ;;  %v2340_v22 = vld [vmem:[%s3294_s1 + $0x350] ss:$8 sps:$4 sm:$0xff]  }
  0x8f   :  { %948 = vmatpush1.bf16.msra.mxu0 %v2286_v23  ;;  %v2345_v23 = vld [vmem:[%s3294_s1 + $0x364] ss:$8 sps:$4 sm:$0xff]  }
  0x90   :  { %949 = vmatprep.subr.bf16.mxu0 %v2291_v26  ;;  %v2346_v26 = vld [vmem:[%s3294_s1 + $0x370] ss:$8 sps:$4 sm:$0xff]  }
  0x93   :  { %950 = vmatpush1.bf16.msra.mxu0 %v2289_v27  ;;  %v2351_v27 = vld [vmem:[%s3294_s1 + $0x384] ss:$8 sps:$4 sm:$0xff]  }
  0x94   :  { %951 = vmatprep.subr.bf16.mxu0 %v2294_v30  ;;  %v2352_v30 = vld [vmem:[%s3294_s1 + $0x390] ss:$8 sps:$4 sm:$0xff]  }
  0x97   :  { %952 = vmatpush1.bf16.msra.mxu0 %v2292_v31  ;;  %v2357_v31 = vld [vmem:[%s3294_s1 + $0x3a4] ss:$8 sps:$4 sm:$0xff]  }
  0x98   :  { %953 = vmatprep.subr.bf16.mxu0 %v2297_v34  ;;  %v2358_v34 = vld [vmem:[%s3294_s1 + $0x3b0] ss:$8 sps:$4 sm:$0xff]  }
  0x9b   :  { %954 = vmatpush1.bf16.msra.mxu0 %v2295_v35  ;;  %v2363_v35 = vld [vmem:[%s3294_s1 + $0x3c4] ss:$8 sps:$4 sm:$0xff]  }
  0x9c   :  { %955 = vmatprep.subr.bf16.mxu0 %v2300_v38  ;;  %v2364_v38 = vld [vmem:[%s3294_s1 + $0x3d0] ss:$8 sps:$4 sm:$0xff]  }
  0x9f   :  { %956 = vmatpush1.bf16.msra.mxu0 %v2298_v40  ;;  %v2367_v40 = vld [vmem:[%s3294_s1 + $0x3e0] ss:$8 sps:$4 sm:$0xff]  }
  0xa0   :  { %957 = vmatprep.subr.bf16.mxu0 %v2303_v42  ;;  %v2370_v42 = vld [vmem:[%s3294_s1 + $0x3f0] ss:$8 sps:$4 sm:$0xff]  }
  0xa3   :  { %958 = vmatpush1.bf16.msra.mxu0 %v2301_v44  ;;  %v2415_v44 = vld [vmem:[%s3296_s3 + $0x1c4] ss:$16 sps:$4 sm:$0xff]  }
  0xa4   :  { %959 = vmatprep.subr.bf16.mxu0 %v2306_v46  ;;  %1467 = vmatprep.subr.bf16.mxu1 %v2415_v44  ;;  %v2418_v46 = vld [vmem:[%s3296_s3 + $0x1e4] ss:$16 sps:$4 sm:$0xff]   ;;  %v2476_v44 = vld [vmem:[%s3297_s5 + $0x18] sm:$0xff]  }
  0xa5   :  { %1468 = vmatpush1.bf16.msra.mxu1 %v2417_v45  ;;  %v2477_v45 = vld [vmem:[%s3297_s5 + $0x60] sm:$0xff]  }
  0xa6   :  { %1469 = vmatprep.subr.bf16.mxu1 %v2418_v46  ;;  %v2478_v46 = vld [vmem:[%s3297_s5 + $0x20] sm:$0xff]  }
  0xa7   :  { %960 = vmatpush1.bf16.msra.mxu0 %v2304_v48  ;;  %v2423_v48 = vld [vmem:[%s3296_s3 + $0xc] ss:$16 sps:$4 sm:$0xff]  }
  0xa8   :  { %961 = vmatprep.subr.bf16.mxu0 %v2309_v50  ;;  %v3072_v50 = vshrl.u32 %v165_v49, 7  ;;  %v2481_v49 = vld [vmem:[%s3297_s5 + $0x70] sm:$0xff]  }
  0xa9   :  { %1470 = vmatpush1.bf16.msra.mxu1 %v2420_v47  ;;  %v2479_v47 = vld [vmem:[%s3297_s5 + $0x68] sm:$0xff]  }
  0xaa   :  { %1482 = vmatprep.subr.bf16.mxu1 %v2423_v48  ;;  %v167_v51 = vsub.s32 0, %v3072_v50  ;;  %v171_v53 = vsub.s32 1, %v3072_v50  ;;  %v2480_v48 = vld [vmem:[%s3297_s5 + $0x28] sm:$0xff]  }
  0xab   :  { %962 = vmatpush1.bf16.msra.mxu0 %v2307_v52  ;;  %v163_v52 = vld [vmem:[%s3298_s2] sm:$0x3] }
  0xac   :  { %963 = vmatprep.subr.bf16.mxu0 %v2312_v54  ;;  %v168_v54 = vrot.slane %v163_v52, %v167_v51  ;;  %v172_v55 = vrot.slane %v163_v52, %v171_v53  ;;  %v2482_v52 = vld [vmem:[%s3297_s5 + $0x30] sm:$0xff]  }
  0xaf   :  { %964 = vmatpush1.bf16.msra.mxu0 %v2310_v56 }
  0xb0   :  { %965 = vmatprep.subr.bf16.mxu0 %v2315_v58 }
  0xb3   :  { %966 = vmatpush1.bf16.msra.mxu0 %v2313_v60 }
  0xb4   :  { %967 = vmatprep.subr.bf16.mxu0 %v2318_v62 }
  0xb7   :  { %968 = vmatpush1.bf16.msra.mxu0 %v2316_v0 }
  0xb8   :  { %969 = vmatprep.subr.bf16.mxu0 %v2321_v2 }
  0xbb   :  { %970 = vmatpush1.bf16.msra.mxu0 %v2319_v4 }
  0xbc   :  { %971 = vmatprep.subr.bf16.mxu0 %v2324_v5 }
  0xbf   :  { %972 = vmatpush1.bf16.msra.mxu0 %v2322_v6  ;;  %v2421_v6 = vld [vmem:[%s3296_s3 + $0x8] ss:$16 sps:$4 sm:$0xff]  }
  0xc0   :  { %984 = vmatprep.subr.bf16.mxu0 %v2327_v7  ;;  %v2426_v7 = vld [vmem:[%s3296_s3 + $0x2c] ss:$16 sps:$4 sm:$0xff]  }
  0xc2   :  { %974 = vmatmul.mubr.bf16.vlgmr.msra.gmra.mrb[0].mxu0 %v1892_v12  ;;  %v2427_v12 = vld [vmem:[%s3296_s3 + $0x48] ss:$16 sps:$4 sm:$0xff]  }
  0xc3   :  { %985 = vmatpush1.bf16.msra.mxu0 %v2325_v13  ;;  %1016 = vmatprep.mubr.bf16.mxu0 %v1895_v14  ;;  %v2432_v13 = vld [vmem:[%s3296_s3 + $0x6c] ss:$16 sps:$4 sm:$0xff]   ;;  %v2430_v14 = vld [vmem:[%s3296_s3 + $0x68] ss:$16 sps:$4 sm:$0xff]  }
  0xc4   :  { %986 = vmatprep.subr.bf16.mxu0 %v2330_v15  ;;  %v2435_v15 = vld [vmem:[%s3296_s3 + $0x8c] ss:$16 sps:$4 sm:$0xff]  }
  0xc7   :  { %987 = vmatpush1.bf16.msra.mxu0 %v2328_v16  ;;  %v2433_v16 = vld [vmem:[%s3296_s3 + $0x88] ss:$16 sps:$4 sm:$0xff]  }
  0xc8   :  { %988 = vmatprep.subr.bf16.mxu0 %v2333_v8  ;;  %v2438_v8 = vld [vmem:[%s3296_s3 + $0xac] ss:$16 sps:$4 sm:$0xff]  }
  0xcb   :  { %989 = vmatpush1.bf16.msra.mxu0 %v2331_v9  ;;  %v2436_v9 = vld [vmem:[%s3296_s3 + $0xa8] ss:$16 sps:$4 sm:$0xff]  }
  0xcc   :  { %990 = vmatprep.subr.bf16.mxu0 %v2336_v17  ;;  %v2441_v17 = vld [vmem:[%s3296_s3 + $0xcc] ss:$16 sps:$4 sm:$0xff]  }
  0xcf   :  { %991 = vmatpush1.bf16.msra.mxu0 %v2334_v18  ;;  %v2439_v18 = vld [vmem:[%s3296_s3 + $0xc8] ss:$16 sps:$4 sm:$0xff]  }
  0xd0   :  { %992 = vmatprep.subr.bf16.mxu0 %v2339_v19  ;;  %v2444_v19 = vld [vmem:[%s3296_s3 + $0xec] ss:$16 sps:$4 sm:$0xff]  }
  0xd3   :  { %993 = vmatpush1.bf16.msra.mxu0 %v2337_v20  ;;  %v2442_v20 = vld [vmem:[%s3296_s3 + $0xe8] ss:$16 sps:$4 sm:$0xff]  }
  0xd4   :  { %994 = vmatprep.subr.bf16.mxu0 %v2342_v21  ;;  %v2447_v21 = vld [vmem:[%s3296_s3 + $0x10c] ss:$16 sps:$4 sm:$0xff]  }
  0xd7   :  { %995 = vmatpush1.bf16.msra.mxu0 %v2340_v22  ;;  %v2445_v22 = vld [vmem:[%s3296_s3 + $0x108] ss:$16 sps:$4 sm:$0xff]  }
  0xd8   :  { %996 = vmatprep.subr.bf16.mxu0 %v2345_v23  ;;  %v2450_v23 = vld [vmem:[%s3296_s3 + $0x12c] ss:$16 sps:$4 sm:$0xff]  }
  0xdb   :  { %997 = vmatpush1.bf16.msra.mxu0 %v2343_v24  ;;  %v2448_v24 = vld [vmem:[%s3296_s3 + $0x128] ss:$16 sps:$4 sm:$0xff]  }
  0xdc   :  { %998 = vmatprep.subr.bf16.mxu0 %v2348_v25  ;;  %v2453_v25 = vld [vmem:[%s3296_s3 + $0x14c] ss:$16 sps:$4 sm:$0xff]  }
  0xdf   :  { %999 = vmatpush1.bf16.msra.mxu0 %v2346_v26  ;;  %v2451_v26 = vld [vmem:[%s3296_s3 + $0x148] ss:$16 sps:$4 sm:$0xff]  }
  0xe0   :  { %1000 = vmatprep.subr.bf16.mxu0 %v2351_v27  ;;  %v2456_v27 = vld [vmem:[%s3296_s3 + $0x16c] ss:$16 sps:$4 sm:$0xff]  }
  0xe3   :  { %1001 = vmatpush1.bf16.msra.mxu0 %v2349_v28  ;;  %v2454_v28 = vld [vmem:[%s3296_s3 + $0x168] ss:$16 sps:$4 sm:$0xff]  }
  0xe4   :  { %1002 = vmatprep.subr.bf16.mxu0 %v2354_v29  ;;  %v2459_v29 = vld [vmem:[%s3296_s3 + $0x18c] ss:$16 sps:$4 sm:$0xff]  }
  0xe7   :  { %1003 = vmatpush1.bf16.msra.mxu0 %v2352_v30  ;;  %v2457_v30 = vld [vmem:[%s3296_s3 + $0x188] ss:$16 sps:$4 sm:$0xff]  }
  0xe8   :  { %1004 = vmatprep.subr.bf16.mxu0 %v2357_v31  ;;  %v2462_v31 = vld [vmem:[%s3296_s3 + $0x1ac] ss:$16 sps:$4 sm:$0xff]  }
  0xeb   :  { %1005 = vmatpush1.bf16.msra.mxu0 %v2355_v32  ;;  %v2460_v32 = vld [vmem:[%s3296_s3 + $0x1a8] ss:$16 sps:$4 sm:$0xff]  }
  0xec   :  { %1006 = vmatprep.subr.bf16.mxu0 %v2360_v33  ;;  %v2465_v33 = vld [vmem:[%s3296_s3 + $0x1cc] ss:$16 sps:$4 sm:$0xff]  }
  0xef   :  { %1007 = vmatpush1.bf16.msra.mxu0 %v2358_v34  ;;  %v2463_v34 = vld [vmem:[%s3296_s3 + $0x1c8] ss:$16 sps:$4 sm:$0xff]  }
  0xf0   :  { %1008 = vmatprep.subr.bf16.mxu0 %v2363_v35  ;;  %v2468_v35 = vld [vmem:[%s3296_s3 + $0x1ec] ss:$16 sps:$4 sm:$0xff]  }
  0xf3   :  { %1009 = vmatpush1.bf16.msra.mxu0 %v2361_v36  ;;  %v2466_v36 = vld [vmem:[%s3296_s3 + $0x1e8] ss:$16 sps:$4 sm:$0xff]  }
  0xf4   :  { %1010 = vmatprep.subr.bf16.mxu0 %v2366_v37  ;;  %v2469_v37 = vld [vmem:[%s3297_s5 + $0x40] sm:$0xff]  }
  0xf7   :  { %1011 = vmatpush1.bf16.msra.mxu0 %v2364_v38  ;;  %v2470_v38 = vld [vmem:[%s3297_s5] sm:$0xff]  }
  0xf8   :  { %1012 = vmatprep.subr.bf16.mxu0 %v2369_v39  ;;  %v2471_v39 = vld [vmem:[%s3297_s5 + $0x48] sm:$0xff]  }
  0xfb   :  { %1013 = vmatpush1.bf16.msra.mxu0 %v2367_v40  ;;  %v2472_v40 = vld [vmem:[%s3297_s5 + $0x8] sm:$0xff]  }
  0xfc   :  { %1014 = vmatprep.subr.bf16.mxu0 %v2372_v41  ;;  %v2473_v41 = vld [vmem:[%s3297_s5 + $0x50] sm:$0xff]  }
  0xff   :  { %1015 = vmatpush1.bf16.msra.mxu0 %v2370_v42  ;;  %v2474_v42 = vld [vmem:[%s3297_s5 + $0x10] sm:$0xff]  }
 0x102   :  { %1017 = vmatmul.mubr.bf16.vlgmr.msra.gmra.mrb[0].mxu0 %v1894_v43  ;;  %v2475_v43 = vld [vmem:[%s3297_s5 + $0x58] sm:$0xff]  }
 0x1d5   :  { %v1018_v56 = vpop.f32.mrb[0].mxu0 }
 0x1d6   :  { %v2165_v57 = vadd.f32 %v1018_v56, %v168_v54  ;;  %v1020_v58 = vpop.f32.mrb[1].mxu0  ;;  %v2485_v56 = vld [vmem:[%s3297_s5 + $0xc0] sm:$0xff]  }
 0x1d7   :  { %v2166_v59 = vadd.f32 %v1020_v58, %v172_v55  ;;  %v1022_v60 = vpop.f32.mrb[2].mxu0 }
 0x1d8   :  { %v2167_v61 = vadd.f32 %v1022_v60, %v168_v54  ;;  %v1024_v62 = vpop.f32.mrb[3].mxu0  ;;  %v1027_v0 = vmax.f32 %v2165_v57, 0.0  ;;  %v2483_v54 = vld [vmem:[%s3297_s5 + $0x78] sm:$0xff]   ;;  %v1097_v57 = vld [vmem:[%s3299_s4] sm:$0xf] }
 0x1d9   :  { %v2168_v63 = vadd.f32 %v1024_v62, %v172_v55  ;;  %v1028_v2 = vmax.f32 %v2166_v59, 0.0  ;;  %v2484_v55 = vld [vmem:[%s3297_s5 + $0x38] sm:$0xff]   ;;  %v1102_v58 = vrot.slane %v1097_v57, %v167_v51  ;;  %v1106_v59 = vrot.slane %v1097_v57, %v171_v53  ;;  %v2486_v51 = vld [vmem:[%s3297_s5 + $0x80] sm:$0xff]   ;;  %v2487_v53 = vld [vmem:[%s3297_s5 + $0xc8] sm:$0xff]  }
 0x1da   :  { %v1029_v1 = vmax.f32 %v2167_v61, 0.0 }
 0x1db   :  { %v1030_v3 = vmax.f32 %v2168_v63, 0.0 }
 0x1dc   :  { %v3083_v4 = vpack.c.bf16 %v1029_v1, %v1027_v0 }
 0x1dd   :  { %v1032_v5 = vpack.c.bf16 %v1030_v3, %v1028_v2 }
 0x1df   :  { %1471 = vmatprep.mubr.bf16.mxu1 %v1032_v5 }
 0x1e0   :  { %1472 = vmatmul.mubr.bf16.vlgmr.msra.gmra.mrb[0].mxu1 %v3083_v4 }
 0x1e1   :  { %1483 = vmatpush1.bf16.msra.mxu1 %v2421_v6  ;;  %1514 = vmatprep.mubr.bf16.mxu1 %v1032_v5 }
 0x1e2   :  { %1484 = vmatprep.subr.bf16.mxu1 %v2426_v7 }
 0x1e5   :  { %1485 = vmatpush1.bf16.msra.mxu1 %v2424_v10 }
 0x1e6   :  { %1486 = vmatprep.subr.bf16.mxu1 %v2429_v11 }
 0x1e9   :  { %1487 = vmatpush1.bf16.msra.mxu1 %v2427_v12  ;;  %v2488_v12 = vld [vmem:[%s3297_s5 + $0x88] sm:$0xff]  }
 0x1ea   :  { %1488 = vmatprep.subr.bf16.mxu1 %v2432_v13  ;;  %v2489_v13 = vld [vmem:[%s3297_s5 + $0xd0] sm:$0xff]  }
 0x1ed   :  { %1489 = vmatpush1.bf16.msra.mxu1 %v2430_v14  ;;  %v2490_v14 = vld [vmem:[%s3297_s5 + $0x90] sm:$0xff]  }
 0x1ee   :  { %1490 = vmatprep.subr.bf16.mxu1 %v2435_v15  ;;  %v2491_v15 = vld [vmem:[%s3297_s5 + $0xd8] sm:$0xff]  }
 0x1f1   :  { %1491 = vmatpush1.bf16.msra.mxu1 %v2433_v16  ;;  %v2492_v16 = vld [vmem:[%s3297_s5 + $0x98] sm:$0xff]  }
 0x1f2   :  { %1492 = vmatprep.subr.bf16.mxu1 %v2438_v8  ;;  %v2493_v8 = vld [vmem:[%s3297_s5 + $0xe0] sm:$0xff]  }
 0x1f5   :  { %1493 = vmatpush1.bf16.msra.mxu1 %v2436_v9  ;;  %v2494_v9 = vld [vmem:[%s3297_s5 + $0xa0] sm:$0xff]  }
 0x1f6   :  { %1494 = vmatprep.subr.bf16.mxu1 %v2441_v17  ;;  %v2495_v17 = vld [vmem:[%s3297_s5 + $0xe8] sm:$0xff]  }
 0x1f9   :  { %1495 = vmatpush1.bf16.msra.mxu1 %v2439_v18  ;;  %v2496_v18 = vld [vmem:[%s3297_s5 + $0xa8] sm:$0xff]  }
 0x1fa   :  { %1496 = vmatprep.subr.bf16.mxu1 %v2444_v19  ;;  %v2497_v19 = vld [vmem:[%s3297_s5 + $0xf0] sm:$0xff]  }
 0x1fd   :  { %1497 = vmatpush1.bf16.msra.mxu1 %v2442_v20  ;;  %v2498_v20 = vld [vmem:[%s3297_s5 + $0xb0] sm:$0xff]  }
 0x1fe   :  { %1498 = vmatprep.subr.bf16.mxu1 %v2447_v21  ;;  %v2499_v21 = vld [vmem:[%s3297_s5 + $0xf8] sm:$0xff]  }
 0x201   :  { %1499 = vmatpush1.bf16.msra.mxu1 %v2445_v22  ;;  %v2500_v22 = vld [vmem:[%s3297_s5 + $0xb8] sm:$0xff]  }
 0x202   :  { %1500 = vmatprep.subr.bf16.mxu1 %v2450_v23  ;;  %v1109_v23 = vsub.s32 2, %v3072_v50 }
 0x205   :  { %1501 = vmatpush1.bf16.msra.mxu1 %v2448_v24  ;;  %v1113_v24 = vsub.s32 3, %v3072_v50 }
 0x206   :  { %1502 = vmatprep.subr.bf16.mxu1 %v2453_v25  ;;  %v1110_v25 = vrot.slane %v1097_v57, %v1109_v23 }
 0x209   :  { %1503 = vmatpush1.bf16.msra.mxu1 %v2451_v26  ;;  %v1114_v26 = vrot.slane %v1097_v57, %v1113_v24 }
 0x20a   :  { %1504 = vmatprep.subr.bf16.mxu1 %v2456_v27 }
 0x20d   :  { %1505 = vmatpush1.bf16.msra.mxu1 %v2454_v28 }
 0x20e   :  { %1506 = vmatprep.subr.bf16.mxu1 %v2459_v29 }
 0x211   :  { %1507 = vmatpush1.bf16.msra.mxu1 %v2457_v30 }
 0x212   :  { %1508 = vmatprep.subr.bf16.mxu1 %v2462_v31 }
 0x215   :  { %1509 = vmatpush1.bf16.msra.mxu1 %v2460_v32 }
 0x216   :  { %1510 = vmatprep.subr.bf16.mxu1 %v2465_v33 }
 0x219   :  { %1511 = vmatpush1.bf16.msra.mxu1 %v2463_v34 }
 0x21a   :  { %1512 = vmatprep.subr.bf16.mxu1 %v2468_v35 }
 0x21d   :  { %1513 = vmatpush1.bf16.msra.mxu1 %v2466_v36 }
 0x21e   :  { %2121 = vmatprep.subr.bf16.mxu1 %v2469_v37 }
 0x220   :  { %1515 = vmatmul.mubr.bf16.vlgmr.msra.gmra.mrb[4].mxu1 %v3083_v4 }
 0x221   :  { %2122 = vmatpush3.bf16.msra.mxu1 %v2470_v38 }
 0x222   :  { %2123 = vmatprep.subr.bf16.mxu1 %v2471_v39 }
 0x225   :  { %2124 = vmatpush3.bf16.msra.mxu1 %v2472_v40 }
 0x226   :  { %2125 = vmatprep.subr.bf16.mxu1 %v2473_v41 }
 0x229   :  { %2126 = vmatpush3.bf16.msra.mxu1 %v2474_v42 }
 0x22a   :  { %2127 = vmatprep.subr.bf16.mxu1 %v2475_v43 }
 0x22d   :  { %2128 = vmatpush3.bf16.msra.mxu1 %v2476_v44 }
 0x22e   :  { %2129 = vmatprep.subr.bf16.mxu1 %v2477_v45 }
 0x231   :  { %2130 = vmatpush3.bf16.msra.mxu1 %v2478_v46  ;;  %v2088_v46 = vld [vmem:[%s3300_s6] ss:$0 sm:$0xff] }
 0x232   :  { %2131 = vmatprep.subr.bf16.mxu1 %v2479_v47 }
 0x235   :  { %2132 = vmatpush3.bf16.msra.mxu1 %v2480_v48 }
 0x236   :  { %2133 = vmatprep.subr.bf16.mxu1 %v2481_v49 }
 0x239   :  { %2134 = vmatpush3.bf16.msra.mxu1 %v2482_v52 }
 0x23a   :  { %2135 = vmatprep.subr.bf16.mxu1 %v2483_v54 }
 0x23d   :  { %2136 = vmatpush3.bf16.msra.mxu1 %v2484_v55 }
 0x23e   :  { %2143 = vmatprep.subr.bf16.mxu1 %v2485_v56 }
 0x2b3   :  { %v1473_v60 = vpop.f32.mrb[0].mxu1 }
 0x2b4   :  { %v1474_v61 = vadd.f32 %v1473_v60, %v1102_v58  ;;  %v1475_v62 = vpop.f32.mrb[1].mxu1 }
 0x2b5   :  { %v1476_v63 = vadd.f32 %v1475_v62, %v1106_v59  ;;  %v1477_v0 = vpop.f32.mrb[2].mxu1 }
 0x2b6   :  { %v1478_v1 = vadd.f32 %v1477_v0, %v1102_v58  ;;  %v1479_v2 = vpop.f32.mrb[3].mxu1  ;;  %v1525_v4 = vmax.f32 %v1474_v61, 0.0 }
 0x2b7   :  { %v1480_v3 = vadd.f32 %v1479_v2, %v1106_v59  ;;  %v1526_v6 = vmax.f32 %v1476_v63, 0.0 }
 0x2b8   :  { %v1529_v5 = vmax.f32 %v1478_v1, 0.0 }
 0x2b9   :  { %v1530_v7 = vmax.f32 %v1480_v3, 0.0 }
 0x2ba   :  { %v1533_v10 = vpack.c.bf16 %v1529_v5, %v1525_v4 }
 0x2bb   :  { %v1534_v11 = vpack.c.bf16 %v1530_v7, %v1526_v6 }
 0x2bd   :  { %1832 = vmatprep.mubr.bf16.mxu1 %v1534_v11 }
 0x2be   :  { %1833 = vmatmul.mubr.bf16.vlgmr.msra.gmra.mrb[8].mxu1 %v1533_v10 }
 0x2bf   :  { %2144 = vmatpush3.bf16.msra.mxu1 %v2486_v51 }
 0x2c0   :  { %2145 = vmatprep.subr.bf16.mxu1 %v2487_v53 }
 0x2c3   :  { %2146 = vmatpush3.bf16.msra.mxu1 %v2488_v12 }
 0x2c4   :  { %2147 = vmatprep.subr.bf16.mxu1 %v2489_v13 }
 0x2c7   :  { %2148 = vmatpush3.bf16.msra.mxu1 %v2490_v14 }
 0x2c8   :  { %2149 = vmatprep.subr.bf16.mxu1 %v2491_v15 }
 0x2cb   :  { %2150 = vmatpush3.bf16.msra.mxu1 %v2492_v16 }
 0x2cc   :  { %2151 = vmatprep.subr.bf16.mxu1 %v2493_v8 }
 0x2cf   :  { %2152 = vmatpush3.bf16.msra.mxu1 %v2494_v9 }
 0x2d0   :  { %2153 = vmatprep.subr.bf16.mxu1 %v2495_v17 }
 0x2d3   :  { %2154 = vmatpush3.bf16.msra.mxu1 %v2496_v18 }
 0x2d4   :  { %2155 = vmatprep.subr.bf16.mxu1 %v2497_v19 }
 0x2d7   :  { %2156 = vmatpush3.bf16.msra.mxu1 %v2498_v20 }
 0x2d8   :  { %2157 = vmatprep.subr.bf16.mxu1 %v2499_v21 }
 0x2db   :  { %2158 = vmatpush3.bf16.msra.mxu1 %v2500_v22 }
 0x2f3   :  { %v1516_v27 = vpop.f32.mrb[4].mxu1 }
 0x2f4   :  { %v1517_v28 = vadd.f32 %v1516_v27, %v1110_v25  ;;  %v1518_v29 = vpop.f32.mrb[5].mxu1 }
 0x2f5   :  { %v1519_v30 = vadd.f32 %v1518_v29, %v1114_v26  ;;  %v1520_v31 = vpop.f32.mrb[6].mxu1 }
 0x2f6   :  { %v1521_v32 = vadd.f32 %v1520_v31, %v1110_v25  ;;  %v1522_v33 = vpop.f32.mrb[7].mxu1  ;;  %v1527_v35 = vmax.f32 %v1517_v28, 0.0 }
 0x2f7   :  { %v1523_v34 = vadd.f32 %v1522_v33, %v1114_v26  ;;  %v1528_v37 = vmax.f32 %v1519_v30, 0.0 }
 0x2f8   :  { %v1531_v36 = vmax.f32 %v1521_v32, 0.0 }
 0x2f9   :  { %v1532_v38 = vmax.f32 %v1523_v34, 0.0 }
 0x2fa   :  { %v1535_v39 = vpack.c.bf16 %v1531_v36, %v1527_v35 }
 0x2fb   :  { %v1536_v40 = vpack.c.bf16 %v1532_v38, %v1528_v37 }
 0x2fd   :  { %1873 = vmatprep.mubr.bf16.mxu1 %v1536_v40 }
 0x2fe   :  { %1874 = vmatmul.mubr.bf16.vlgmr.msra.gmra.mrb[12].mxu1 %v1535_v39 }
 0x391   :  { %v2137_v41 = vpop.f32.mrb[8].mxu1 }
 0x392   :  { %v2138_v50 = vpop.f32.mrb[9].mxu1 }
 0x393   :  { %v2139_v42 = vadd.f32 %v2138_v50, %v2137_v41  ;;  %v2140_v43 = vpop.f32.mrb[10].mxu1 }
 0x394   :  { %v2141_v44 = vpop.f32.mrb[11].mxu1 }
 0x395   :  { %v2142_v45 = vadd.f32 %v2141_v44, %v2140_v43  ;;  %v1835_v49 = vadd.f32 %v2139_v42, %v2088_v46 }
 0x397   :  { %v1838_v56 = vadd.f32 %v2142_v45, %v2088_v46 }
 0x3d1   :  { %v2159_v47 = vpop.f32.mrb[12].mxu1 }
 0x3d2   :  { %v2160_v48 = vpop.f32.mrb[13].mxu1 }
 0x3d3   :  { %v2161_v52 = vadd.f32 %v2160_v48, %v2159_v47  ;;  %v2162_v54 = vpop.f32.mrb[14].mxu1 }
 0x3d4   :  { %v2163_v55 = vpop.f32.mrb[15].mxu1 }
 0x3d5   :  { %v1876_v57 = vadd.f32 %v2161_v52, %v1835_v49  ;;  %v2164_v58 = vadd.f32 %v2163_v55, %v2162_v54 }
 0x3d7   :  { %1882 = vst [vmem:[%s3301_s7] sm:$0xff] %v1876_v57  ;;  %v1879_v59 = vadd.f32 %v2164_v58, %v1838_v56 }
 0x3d9   :  { %1883 = vst [vmem:[%s3301_s7 + $0x8] sm:$0xff] %v1879_v59 }

</bundles_post_ra>
